<compile_context>
chip_gen: v7x
topology: tpu7x:2x2x1
jax: 0.10.0
libtpu: 0.0.40
codegen_flags: <defaults>
</compile_context>

<pallas_src>
import jax
import jax.numpy as jnp
from jax.experimental import pallas as pl
from jax.experimental.pallas import tpu as pltpu

FEATURE_DIM = 16   # CNNExtract out_channels (c2)
HIDDEN_DIM = 32    # LSTM hidden size
C1 = 8             # first conv out channels
FRAMES_PER_CHUNK = 8   # grid chunk over B*S frames


# ---------------------------------------------------------------------------
# Fused kernel: conv(1->8,3x3,pad1)+ReLU -> conv(8->16,3x3,pad1)+ReLU ->
# spatial mean -> LSTM (single layer) -> Linear(hidden, 1) on h_T.
# ---------------------------------------------------------------------------
def cnn_lstm_kernel(xp_ref, b1m_ref, b1t_ref, b2m_ref, b2t_ref,
                    wih_ref, bl_ref, whh_ref, fcw_ref, fcb_ref,
                    out_ref, y1pad_ref, gx_ref):
    # xp_ref : (cn, H+2, W)        frame chunk, rows zero-padded by 1 (time-major n = s*B + b)
    # b1m_ref: (3W, W*c1)          banded conv1 weights (K = 3W im2col)
    # b1t_ref: (1, W*c1)           conv1 bias tiled over columns
    # b2m_ref: (3*W*c1, W*c2)      banded conv2 weights, one (W*c1, W*c2) block per di
    # b2t_ref: (1, W*c2)           conv2 bias tiled over columns
    # wih_ref: (W*c2, 4H)          W_ih tiled over columns, 1/(H*W) mean folded in
    # bl_ref : (1, 4H)   whh_ref: (H, 4H)   fcw_ref: (H, 1)   fcb_ref: (1, 1)
    # out_ref: (B, 1)
    # y1pad_ref: (cn, H+2, W*c1)   scratch: relu(conv1) on a zero-padded row canvas
    # gx_ref : (N, 4H)             scratch: per-frame LSTM gate pre-activations
    ci = pl.program_id(0)
    last = pl.num_programs(0) - 1

    cn, hp2, W = xp_ref.shape
    H = hp2 - 2
    WC1 = b1t_ref.shape[1]
    WC2 = b2t_ref.shape[1]
    Hd = whh_ref.shape[0]
    N = gx_ref.shape[0]
    B = out_ref.shape[0]
    S = N // B
    M = cn * H                       # pixel-rows handled by this chunk

    # Zero the padded conv1-output canvas once; border rows stay zero forever
    # and ARE conv2's zero padding (no iota/where mask).
    @pl.when(ci == 0)
    def _zero_canvas():
        y1pad_ref[...] = jnp.zeros_like(y1pad_ref)

    # ---- conv1: one banded im2col matmul, K = 3W (lane concat is XLU work) --
    lhs1 = jnp.concatenate(
        [xp_ref[:, di:di + H, :].reshape(M, W) for di in range(3)], axis=-1)
    y1 = jnp.maximum(
        jnp.dot(lhs1, b1m_ref[...], preferred_element_type=jnp.float32)
        + b1t_ref[...], 0.0)                                   # (M, W*c1) lane dense

    # interior store == zero-padded relu(conv1) as seen by conv2
    y1pad_ref[:, 1:H + 1, :] = y1.reshape(cn, H, WC1)

    # ---- conv2: 3 banded matmuls (K = W*c1 = 128 each), bias folded in ------
    acc = jnp.dot(y1pad_ref[:, 0:H, :].reshape(M, WC1), b2m_ref[0:WC1, :],
                  preferred_element_type=jnp.float32) + b2t_ref[...]
    for di in (1, 2):
        acc = acc + jnp.dot(y1pad_ref[:, di:di + H, :].reshape(M, WC1),
                            b2m_ref[di * WC1:(di + 1) * WC1, :],
                            preferred_element_type=jnp.float32)
    y2 = jnp.maximum(acc, 0.0)                                 # (M, W*c2) lane dense

    # ---- spatial mean + LSTM input projection (scale folded into wih_ref) ---
    rowsum = jnp.sum(y2.reshape(cn, H, WC2), axis=1)           # (cn, W*c2)
    gx = jnp.dot(rowsum, wih_ref[...],
                 preferred_element_type=jnp.float32) + bl_ref[...]
    row0 = pl.multiple_of(ci * cn, cn)
    gx_ref[pl.ds(row0, cn), :] = gx                            # resident accumulator

    # ---- LSTM recurrence + FC head, once, on the last chunk -----------------
    @pl.when(ci == last)
    def _lstm_fc_epilogue():
        whh = whh_ref[...]
        gall = gx_ref[...]                                     # (N, 4H), time-major rows
        h = jnp.zeros((B, Hd), jnp.float32)
        c = jnp.zeros((B, Hd), jnp.float32)
        for t in range(S):                                     # S small & static
            gates = gall[t * B:(t + 1) * B, :] + jnp.dot(
                h, whh, preferred_element_type=jnp.float32)    # (B, 4H)
            sg = 0.5 * (jnp.tanh(0.5 * gates) + 1.0)           # sigmoid via tanh (EUP)
            tg = jnp.tanh(gates)
            i_g = sg[:, 0 * Hd:1 * Hd]                         # PyTorch order i, f, g, o
            f_g = sg[:, 1 * Hd:2 * Hd]
            g_g = tg[:, 2 * Hd:3 * Hd]
            o_g = sg[:, 3 * Hd:4 * Hd]
            c = f_g * c + i_g * g_g
            h = o_g * jnp.tanh(c)
        out_ref[...] = (jnp.dot(h, fcw_ref[...],
                                preferred_element_type=jnp.float32)
                        + fcb_ref[...])


# ---------------------------------------------------------------------------
# Wrapper: layout plumbing only (time-major flatten, row padding, banded
# weight-matrix construction, bias tiling, mean-scale folding).
# ---------------------------------------------------------------------------
def cnn_lstm_value(x, p):
    Bsz, S, H, W = x.shape
    N = Bsz * S
    c1 = p["w1"].shape[0]
    c2 = p["w2"].shape[0]
    Hd = p["w_hh"].shape[1]
    f32 = jnp.float32

    # time-major frames (row n = s*B + b), rows padded by 1.  Column padding of
    # both convs is baked into the banded matrices, so no W padding and no
    # trailing singleton channel dim.
    xt = jnp.transpose(x, (1, 0, 2, 3)).reshape(N, H, W).astype(f32)
    xp = jnp.pad(xt, ((0, 0), (1, 1), (0, 0)))                 # (N, H+2, W)

    # shift matrices S_dj[jj, j] = 1 iff jj == j + dj - 1 (zero outside == pad)
    jjv = jnp.arange(W)[:, None]
    jv = jnp.arange(W)[None, :]
    smats = [(jjv == (jv + dj - 1)).astype(f32) for dj in range(3)]

    # conv1 band: B1[di*W + jj, j*c1 + c] = w1[c, 0, di, dj] iff jj == j+dj-1
    w1k = p["w1"][:, 0, :, :].astype(f32)                      # (c1, 3, 3)
    b1_blocks = []
    for di in range(3):
        blk = jnp.zeros((W, W * c1), f32)
        for dj in range(3):
            blk = blk + jnp.einsum("xj,c->xjc", smats[dj],
                                   w1k[:, di, dj]).reshape(W, W * c1)
        b1_blocks.append(blk)
    b1m = jnp.concatenate(b1_blocks, axis=0)                   # (3W, W*c1)
    b1t = jnp.tile(p["b1"].astype(f32), (W,)).reshape(1, W * c1)

    # conv2 bands: B2[di][jj*c1 + cin, j*c2 + cout] = w2[cout, cin, di, dj]
    b2_blocks = []
    for di in range(3):
        blk = jnp.zeros((W * c1, W * c2), f32)
        for dj in range(3):
            wt = p["w2"][:, :, di, dj].astype(f32).T           # (c1, c2)
            blk = blk + jnp.einsum("xj,ck->xcjk", smats[dj],
                                   wt).reshape(W * c1, W * c2)
        b2_blocks.append(blk)
    b2m = jnp.concatenate(b2_blocks, axis=0)                   # (3*W*c1, W*c2)
    b2t = jnp.tile(p["b2"].astype(f32), (W,)).reshape(1, W * c2)

    # LSTM input projection: tile W_ih over columns and fold in the spatial
    # mean scale -> in-kernel: row-sum then one matmul.
    wih_big = jnp.tile(p["w_ih"].astype(f32).T, (W, 1)) / float(H * W)  # (W*c2, 4H)
    bl = (p["b_ih"] + p["b_hh"]).astype(f32).reshape(1, 4 * Hd)
    whh_t = p["w_hh"].astype(f32).T                            # (Hd, 4Hd)
    fcw_t = p["fc_w"].astype(f32).T                            # (Hd, 1)
    fcb = p["fc_b"].astype(f32).reshape(1, 1)

    # frame-chunk grid (sequential: chunks accumulate into the resident gx scratch)
    cn = 1
    for cand in range(min(FRAMES_PER_CHUNK, N), 0, -1):
        if N % cand == 0:
            cn = cand
            break
    n_chunks = N // cn

    def full_spec(a):
        nd = a.ndim

        def idx(i):
            return (0,) * nd

        return pl.BlockSpec(a.shape, idx)

    value = pl.pallas_call(
        cnn_lstm_kernel,
        out_shape=jax.ShapeDtypeStruct((Bsz, 1), f32),
        grid=(n_chunks,),
        in_specs=[pl.BlockSpec((cn, H + 2, W), lambda i: (i, 0, 0))]
                 + [full_spec(a) for a in
                    (b1m, b1t, b2m, b2t, wih_big, bl, whh_t, fcw_t, fcb)],
        out_specs=pl.BlockSpec((Bsz, 1), lambda i: (0, 0)),
        scratch_shapes=[pltpu.VMEM((cn, H + 2, W * c1), f32),
                        pltpu.VMEM((N, 4 * Hd), f32)],
        compiler_params=pltpu.CompilerParams(
            dimension_semantics=("arbitrary",),
            vmem_limit_bytes=32 * 1024 * 1024),
    )(xp, b1m, b1t, b2m, b2t, wih_big, bl, whh_t, fcw_t, fcb)
    return value


# ---------------------------------------------------------------------------
# Deterministic parameter init (shapes match the PyTorch module __init__)
# ---------------------------------------------------------------------------
def init_params(key):
    ks = jax.random.split(key, 10)
    n = lambda k, s: 0.1 * jax.random.normal(k, s, jnp.float32)
    return {
        "w1": n(ks[0], (C1, 1, 3, 3)),
        "b1": n(ks[1], (C1,)),
        "w2": n(ks[2], (FEATURE_DIM, C1, 3, 3)),
        "b2": n(ks[3], (FEATURE_DIM,)),
        "w_ih": n(ks[4], (4 * HIDDEN_DIM, FEATURE_DIM)),
        "w_hh": n(ks[5], (4 * HIDDEN_DIM, HIDDEN_DIM)),
        "b_ih": n(ks[6], (4 * HIDDEN_DIM,)),
        "b_hh": n(ks[7], (4 * HIDDEN_DIM,)),
        "fc_w": n(ks[8], (1, HIDDEN_DIM)),
        "fc_b": n(ks[9], (1,)),
    }


# Pure-JAX reference of the PyTorch forward (for correctness checking)
def ref_forward(x, p):
    B, S, H, W = x.shape
    xf = x.reshape(B * S, 1, H, W)
    y1 = jax.lax.conv_general_dilated(
        xf, p["w1"], (1, 1), "SAME", dimension_numbers=("NCHW", "OIHW", "NCHW"))
    y1 = jax.nn.relu(y1 + p["b1"].reshape(1, C1, 1, 1))
    y2 = jax.lax.conv_general_dilated(
        y1, p["w2"], (1, 1), "SAME", dimension_numbers=("NCHW", "OIHW", "NCHW"))
    y2 = jax.nn.relu(y2 + p["b2"].reshape(1, FEATURE_DIM, 1, 1))
    feat = y2.mean(axis=(2, 3)).reshape(B, S, FEATURE_DIM)

    h = jnp.zeros((B, HIDDEN_DIM), jnp.float32)
    c = jnp.zeros((B, HIDDEN_DIM), jnp.float32)
    for t in range(S):
        g = feat[:, t, :] @ p["w_ih"].T + p["b_ih"] + h @ p["w_hh"].T + p["b_hh"]
        i = jax.nn.sigmoid(g[:, 0 * HIDDEN_DIM:1 * HIDDEN_DIM])
        f = jax.nn.sigmoid(g[:, 1 * HIDDEN_DIM:2 * HIDDEN_DIM])
        gg = jnp.tanh(g[:, 2 * HIDDEN_DIM:3 * HIDDEN_DIM])
        o = jax.nn.sigmoid(g[:, 3 * HIDDEN_DIM:4 * HIDDEN_DIM])
        c = f * c + i * gg
        h = o * jnp.tanh(c)
    return h @ p["fc_w"].T + p["fc_b"]


if __name__ == "__main__":
    key = jax.random.PRNGKey(0)
    kx, kp = jax.random.split(key)
    x = jax.random.normal(kx, (2, 8, 16, 16), jnp.float32)   # (batch, seq, h, w)
    params = init_params(kp)

    out = cnn_lstm_value(x, params)
    jax.block_until_ready(out)
    assert out.shape == (2, 1), out.shape

    ref = ref_forward(x, params)
    assert jnp.allclose(out, ref, atol=1e-3, rtol=1e-3), (out, ref)

    print("KERNEL_OK")
</pallas_src>

<mosaic_0001>
module attributes {stable_mosaic.version = 11 : i64} {
  func.func @cnn_lstm_kernel(%arg0: i32, %arg1: memref<8x18x16xf32, #tpu.memory_space<vmem>>, %arg2: memref<48x128xf32, #tpu.memory_space<vmem>>, %arg3: memref<1x128xf32, #tpu.memory_space<vmem>>, %arg4: memref<384x256xf32, #tpu.memory_space<vmem>>, %arg5: memref<1x256xf32, #tpu.memory_space<vmem>>, %arg6: memref<256x128xf32, #tpu.memory_space<vmem>>, %arg7: memref<1x128xf32, #tpu.memory_space<vmem>>, %arg8: memref<32x128xf32, #tpu.memory_space<vmem>>, %arg9: memref<32x1xf32, #tpu.memory_space<vmem>>, %arg10: memref<1x1xf32, #tpu.memory_space<vmem>>, %arg11: memref<2x1xf32, #tpu.memory_space<vmem>>, %arg12: memref<8x18x128xf32, #tpu.memory_space<vmem>>, %arg13: memref<16x128xf32, #tpu.memory_space<vmem>>) attributes {dimension_semantics = [#tpu.dimension_semantics<arbitrary>], iteration_bounds = array<i64: 2>, scalar_prefetch = 0 : i64, scratch_operands = 2 : i64, tpu.core_type = #tpu.core_type<tc>, window_params = [{transform_indices = @transform_0, window_bounds = array<i64: 8, 18, 16>}, {pipeline_mode = #tpu.pipeline_mode<synchronous>, transform_indices = @transform_1, window_bounds = array<i64: 48, 128>}, {pipeline_mode = #tpu.pipeline_mode<synchronous>, transform_indices = @transform_2, window_bounds = array<i64: 1, 128>}, {pipeline_mode = #tpu.pipeline_mode<synchronous>, transform_indices = @transform_3, window_bounds = array<i64: 384, 256>}, {pipeline_mode = #tpu.pipeline_mode<synchronous>, transform_indices = @transform_4, window_bounds = array<i64: 1, 256>}, {pipeline_mode = #tpu.pipeline_mode<synchronous>, transform_indices = @transform_5, window_bounds = array<i64: 256, 128>}, {pipeline_mode = #tpu.pipeline_mode<synchronous>, transform_indices = @transform_6, window_bounds = array<i64: 1, 128>}, {pipeline_mode = #tpu.pipeline_mode<synchronous>, transform_indices = @transform_7, window_bounds = array<i64: 32, 128>}, {pipeline_mode = #tpu.pipeline_mode<synchronous>, transform_indices = @transform_8, window_bounds = array<i64: 32, 1>}, {pipeline_mode = #tpu.pipeline_mode<synchronous>, transform_indices = @transform_9, window_bounds = array<i64: 1, 1>}, {pipeline_mode = #tpu.pipeline_mode<synchronous>, transform_indices = @transform_10, window_bounds = array<i64: 2, 1>}]} {
    %c0_i32 = arith.constant 0 : i32
    %0 = arith.cmpi eq, %arg0, %c0_i32 : i32
    %1 = arith.extui %0 : i1 to i32
    %c0_i32_0 = arith.constant 0 : i32
    %2 = arith.cmpi ne, %1, %c0_i32_0 : i32
    scf.if %2 {
      %cst_42 = arith.constant 0.000000e+00 : f32
      %52 = vector.broadcast %cst_42 : f32 to vector<8x18x128xf32>
      %c0_43 = arith.constant 0 : index
      %c0_44 = arith.constant 0 : index
      %c0_45 = arith.constant 0 : index
      %53 = vector.load %arg12[%c0_43, %c0_44, %c0_45] : memref<8x18x128xf32, #tpu.memory_space<vmem>>, vector<8x18x128xf32>
      tpu.vector_store %arg12[%c0_43, %c0_44, %c0_45], %52 {strides = array<i32>} : memref<8x18x128xf32, #tpu.memory_space<vmem>>, vector<8x18x128xf32>,
    } else {
    }
    %c0 = arith.constant 0 : index
    %c0_1 = arith.constant 0 : index
    %c0_2 = arith.constant 0 : index
    %3 = vector.load %arg1[%c0, %c0_1, %c0_2] : memref<8x18x16xf32, #tpu.memory_space<vmem>>, vector<8x16x16xf32>
    %4 = vector.shape_cast %3 : vector<8x16x16xf32> to vector<128x16xf32>
    %c0_3 = arith.constant 0 : index
    %c1 = arith.constant 1 : index
    %c0_4 = arith.constant 0 : index
    %5 = vector.load %arg1[%c0_3, %c1, %c0_4] : memref<8x18x16xf32, #tpu.memory_space<vmem>>, vector<8x16x16xf32>
    %6 = vector.shape_cast %5 : vector<8x16x16xf32> to vector<128x16xf32>
    %c0_5 = arith.constant 0 : index
    %c2 = arith.constant 2 : index
    %c0_6 = arith.constant 0 : index
    %7 = vector.load %arg1[%c0_5, %c2, %c0_6] : memref<8x18x16xf32, #tpu.memory_space<vmem>>, vector<8x16x16xf32>
    %8 = vector.shape_cast %7 : vector<8x16x16xf32> to vector<128x16xf32>
    %9 = tpu.concatenate %4, %6, %8 in 1 : vector<128x16xf32>, vector<128x16xf32>, vector<128x16xf32> -> vector<128x48xf32>
    %c0_7 = arith.constant 0 : index
    %c0_8 = arith.constant 0 : index
    %10 = vector.load %arg2[%c0_7, %c0_8] : memref<48x128xf32, #tpu.memory_space<vmem>>, vector<48x128xf32>
    %cst = arith.constant dense<0.000000e+00> : vector<128x128xf32>
    %11 = tpu.matmul %9, %10, %cst {dimension_numbers = #tpu.dot_dimension_numbers<[1], [0], [0], [1], [0, 0, 1, 1], [], []>} : vector<128x48xf32>, vector<48x128xf32>, vector<128x128xf32> -> vector<128x128xf32>
    %c0_9 = arith.constant 0 : index
    %c0_10 = arith.constant 0 : index
    %12 = vector.load %arg3[%c0_9, %c0_10] : memref<1x128xf32, #tpu.memory_space<vmem>>, vector<1x128xf32>
    %13 = vector.broadcast %12 : vector<1x128xf32> to vector<128x128xf32>
    %14 = arith.addf %11, %13 : vector<128x128xf32>
    %cst_11 = arith.constant 0.000000e+00 : f32
    %15 = vector.broadcast %cst_11 : f32 to vector<128x128xf32>
    %16 = arith.maximumf %14, %15 : vector<128x128xf32>
    %17 = vector.shape_cast %16 : vector<128x128xf32> to vector<8x16x128xf32>
    %c0_12 = arith.constant 0 : index
    %c1_13 = arith.constant 1 : index
    %c0_14 = arith.constant 0 : index
    %18 = vector.load %arg12[%c0_12, %c1_13, %c0_14] : memref<8x18x128xf32, #tpu.memory_space<vmem>>, vector<8x16x128xf32>
    tpu.vector_store %arg12[%c0_12, %c1_13, %c0_14], %17 {strides = array<i32>} : memref<8x18x128xf32, #tpu.memory_space<vmem>>, vector<8x16x128xf32>,
    %c0_15 = arith.constant 0 : index
    %c0_16 = arith.constant 0 : index
    %c0_17 = arith.constant 0 : index
    %19 = vector.load %arg12[%c0_15, %c0_16, %c0_17] : memref<8x18x128xf32, #tpu.memory_space<vmem>>, vector<8x16x128xf32>
    %20 = vector.shape_cast %19 : vector<8x16x128xf32> to vector<128x128xf32>
    %c0_18 = arith.constant 0 : index
    %c0_19 = arith.constant 0 : index
    %21 = vector.load %arg4[%c0_18, %c0_19] : memref<384x256xf32, #tpu.memory_space<vmem>>, vector<128x256xf32>
    %cst_20 = arith.constant dense<0.000000e+00> : vector<128x256xf32>
    %22 = tpu.matmul %20, %21, %cst_20 {dimension_numbers = #tpu.dot_dimension_numbers<[1], [0], [0], [1], [0, 0, 1, 1], [], []>} : vector<128x128xf32>, vector<128x256xf32>, vector<128x256xf32> -> vector<128x256xf32>
    %c0_21 = arith.constant 0 : index
    %c0_22 = arith.constant 0 : index
    %23 = vector.load %arg5[%c0_21, %c0_22] : memref<1x256xf32, #tpu.memory_space<vmem>>, vector<1x256xf32>
    %24 = vector.broadcast %23 : vector<1x256xf32> to vector<128x256xf32>
    %25 = arith.addf %22, %24 : vector<128x256xf32>
    %c0_23 = arith.constant 0 : index
    %c1_24 = arith.constant 1 : index
    %c0_25 = arith.constant 0 : index
    %26 = vector.load %arg12[%c0_23, %c1_24, %c0_25] : memref<8x18x128xf32, #tpu.memory_space<vmem>>, vector<8x16x128xf32>
    %27 = vector.shape_cast %26 : vector<8x16x128xf32> to vector<128x128xf32>
    %c128 = arith.constant 128 : index
    %c0_26 = arith.constant 0 : index
    %28 = vector.load %arg4[%c128, %c0_26] : memref<384x256xf32, #tpu.memory_space<vmem>>, vector<128x256xf32>
    %cst_27 = arith.constant dense<0.000000e+00> : vector<128x256xf32>
    %29 = tpu.matmul %27, %28, %cst_27 {dimension_numbers = #tpu.dot_dimension_numbers<[1], [0], [0], [1], [0, 0, 1, 1], [], []>} : vector<128x128xf32>, vector<128x256xf32>, vector<128x256xf32> -> vector<128x256xf32>
    %30 = arith.addf %25, %29 : vector<128x256xf32>
    %c0_28 = arith.constant 0 : index
    %c2_29 = arith.constant 2 : index
    %c0_30 = arith.constant 0 : index
    %31 = vector.load %arg12[%c0_28, %c2_29, %c0_30] : memref<8x18x128xf32, #tpu.memory_space<vmem>>, vector<8x16x128xf32>
    %32 = vector.shape_cast %31 : vector<8x16x128xf32> to vector<128x128xf32>
    %c256 = arith.constant 256 : index
    %c0_31 = arith.constant 0 : index
    %33 = vector.load %arg4[%c256, %c0_31] : memref<384x256xf32, #tpu.memory_space<vmem>>, vector<128x256xf32>
    %cst_32 = arith.constant dense<0.000000e+00> : vector<128x256xf32>
    %34 = tpu.matmul %32, %33, %cst_32 {dimension_numbers = #tpu.dot_dimension_numbers<[1], [0], [0], [1], [0, 0, 1, 1], [], []>} : vector<128x128xf32>, vector<128x256xf32>, vector<128x256xf32> -> vector<128x256xf32>
    %35 = arith.addf %30, %34 : vector<128x256xf32>
    %cst_33 = arith.constant 0.000000e+00 : f32
    %36 = vector.broadcast %cst_33 : f32 to vector<128x256xf32>
    %37 = arith.maximumf %35, %36 : vector<128x256xf32>
    %38 = vector.shape_cast %37 : vector<128x256xf32> to vector<8x16x256xf32>
    %cst_34 = arith.constant dense<0.000000e+00> : vector<8x256xf32>
    %39 = vector.multi_reduction <add>, %38, %cst_34 [1] : vector<8x16x256xf32> to vector<8x256xf32>
    %c0_35 = arith.constant 0 : index
    %c0_36 = arith.constant 0 : index
    %40 = vector.load %arg6[%c0_35, %c0_36] : memref<256x128xf32, #tpu.memory_space<vmem>>, vector<256x128xf32>
    %cst_37 = arith.constant dense<0.000000e+00> : vector<8x128xf32>
    %41 = tpu.matmul %39, %40, %cst_37 {dimension_numbers = #tpu.dot_dimension_numbers<[1], [0], [0], [1], [0, 0, 1, 1], [], []>} : vector<8x256xf32>, vector<256x128xf32>, vector<8x128xf32> -> vector<8x128xf32>
    %c0_38 = arith.constant 0 : index
    %c0_39 = arith.constant 0 : index
    %42 = vector.load %arg7[%c0_38, %c0_39] : memref<1x128xf32, #tpu.memory_space<vmem>>, vector<1x128xf32>
    %43 = vector.broadcast %42 : vector<1x128xf32> to vector<8x128xf32>
    %44 = arith.addf %41, %43 : vector<8x128xf32>
    %c8_i32 = arith.constant 8 : i32
    %45 = arith.muli %arg0, %c8_i32 : i32
    %46 = tpu.assume_multiple %45, 8 : i32
    %47 = arith.index_cast %46 : i32 to index
    %c0_40 = arith.constant 0 : index
    %48 = vector.load %arg13[%47, %c0_40] : memref<16x128xf32, #tpu.memory_space<vmem>>, vector<8x128xf32>
    tpu.vector_store %arg13[%47, %c0_40], %44 {strides = array<i32>} : memref<16x128xf32, #tpu.memory_space<vmem>>, vector<8x128xf32>,
    %c1_i32 = arith.constant 1 : i32
    %49 = arith.cmpi eq, %arg0, %c1_i32 : i32
    %50 = arith.extui %49 : i1 to i32
    %c0_i32_41 = arith.constant 0 : i32
    %51 = arith.cmpi ne, %50, %c0_i32_41 : i32
    scf.if %51 {
      %c0_42 = arith.constant 0 : index
      %c0_43 = arith.constant 0 : index
      %52 = vector.load %arg8[%c0_42, %c0_43] : memref<32x128xf32, #tpu.memory_space<vmem>>, vector<32x128xf32>
      %c0_44 = arith.constant 0 : index
      %c0_45 = arith.constant 0 : index
      %53 = vector.load %arg13[%c0_44, %c0_45] : memref<16x128xf32, #tpu.memory_space<vmem>>, vector<16x128xf32>
      %cst_46 = arith.constant 0.000000e+00 : f32
      %54 = vector.broadcast %cst_46 : f32 to vector<2x32xf32>
      %cst_47 = arith.constant 0.000000e+00 : f32
      %55 = vector.broadcast %cst_47 : f32 to vector<2x32xf32>
      %56 = vector.extract_strided_slice %53 {offsets = [0, 0], sizes = [2, 128], strides = [1, 1]} : vector<16x128xf32> to vector<2x128xf32>
      %cst_48 = arith.constant dense<0.000000e+00> : vector<2x128xf32>
      %57 = tpu.matmul %54, %52, %cst_48 {dimension_numbers = #tpu.dot_dimension_numbers<[1], [0], [0], [1], [0, 0, 1, 1], [], []>} : vector<2x32xf32>, vector<32x128xf32>, vector<2x128xf32> -> vector<2x128xf32>
      %58 = arith.addf %56, %57 : vector<2x128xf32>
      %cst_49 = arith.constant 5.000000e-01 : f32
      %59 = vector.broadcast %cst_49 : f32 to vector<2x128xf32>
      %60 = arith.mulf %59, %58 : vector<2x128xf32>
      %61 = math.tanh %60 : vector<2x128xf32>
      %cst_50 = arith.constant 1.000000e+00 : f32
      %62 = vector.broadcast %cst_50 : f32 to vector<2x128xf32>
      %63 = arith.addf %61, %62 : vector<2x128xf32>
      %cst_51 = arith.constant 5.000000e-01 : f32
      %64 = vector.broadcast %cst_51 : f32 to vector<2x128xf32>
      %65 = arith.mulf %64, %63 : vector<2x128xf32>
      %66 = math.tanh %58 : vector<2x128xf32>
      %67 = vector.extract_strided_slice %65 {offsets = [0, 0], sizes = [2, 32], strides = [1, 1]} : vector<2x128xf32> to vector<2x32xf32>
      %68 = vector.extract_strided_slice %65 {offsets = [0, 32], sizes = [2, 32], strides = [1, 1]} : vector<2x128xf32> to vector<2x32xf32>
      %69 = vector.extract_strided_slice %66 {offsets = [0, 64], sizes = [2, 32], strides = [1, 1]} : vector<2x128xf32> to vector<2x32xf32>
      %70 = vector.extract_strided_slice %65 {offsets = [0, 96], sizes = [2, 32], strides = [1, 1]} : vector<2x128xf32> to vector<2x32xf32>
      %71 = arith.mulf %68, %55 : vector<2x32xf32>
      %72 = arith.mulf %67, %69 : vector<2x32xf32>
      %73 = arith.addf %71, %72 : vector<2x32xf32>
      %74 = math.tanh %73 : vector<2x32xf32>
      %75 = arith.mulf %70, %74 : vector<2x32xf32>
      %76 = vector.extract_strided_slice %53 {offsets = [2, 0], sizes = [2, 128], strides = [1, 1]} : vector<16x128xf32> to vector<2x128xf32>
      %cst_52 = arith.constant dense<0.000000e+00> : vector<2x128xf32>
      %77 = tpu.matmul %75, %52, %cst_52 {dimension_numbers = #tpu.dot_dimension_numbers<[1], [0], [0], [1], [0, 0, 1, 1], [], []>} : vector<2x32xf32>, vector<32x128xf32>, vector<2x128xf32> -> vector<2x128xf32>
      %78 = arith.addf %76, %77 : vector<2x128xf32>
      %cst_53 = arith.constant 5.000000e-01 : f32
      %79 = vector.broadcast %cst_53 : f32 to vector<2x128xf32>
      %80 = arith.mulf %79, %78 : vector<2x128xf32>
      %81 = math.tanh %80 : vector<2x128xf32>
      %cst_54 = arith.constant 1.000000e+00 : f32
      %82 = vector.broadcast %cst_54 : f32 to vector<2x128xf32>
      %83 = arith.addf %81, %82 : vector<2x128xf32>
      %cst_55 = arith.constant 5.000000e-01 : f32
      %84 = vector.broadcast %cst_55 : f32 to vector<2x128xf32>
      %85 = arith.mulf %84, %83 : vector<2x128xf32>
      %86 = math.tanh %78 : vector<2x128xf32>
      %87 = vector.extract_strided_slice %85 {offsets = [0, 0], sizes = [2, 32], strides = [1, 1]} : vector<2x128xf32> to vector<2x32xf32>
      %88 = vector.extract_strided_slice %85 {offsets = [0, 32], sizes = [2, 32], strides = [1, 1]} : vector<2x128xf32> to vector<2x32xf32>
      %89 = vector.extract_strided_slice %86 {offsets = [0, 64], sizes = [2, 32], strides = [1, 1]} : vector<2x128xf32> to vector<2x32xf32>
      %90 = vector.extract_strided_slice %85 {offsets = [0, 96], sizes = [2, 32], strides = [1, 1]} : vector<2x128xf32> to vector<2x32xf32>
      %91 = arith.mulf %88, %73 : vector<2x32xf32>
      %92 = arith.mulf %87, %89 : vector<2x32xf32>
      %93 = arith.addf %91, %92 : vector<2x32xf32>
      %94 = math.tanh %93 : vector<2x32xf32>
      %95 = arith.mulf %90, %94 : vector<2x32xf32>
      %96 = vector.extract_strided_slice %53 {offsets = [4, 0], sizes = [2, 128], strides = [1, 1]} : vector<16x128xf32> to vector<2x128xf32>
      %cst_56 = arith.constant dense<0.000000e+00> : vector<2x128xf32>
      %97 = tpu.matmul %95, %52, %cst_56 {dimension_numbers = #tpu.dot_dimension_numbers<[1], [0], [0], [1], [0, 0, 1, 1], [], []>} : vector<2x32xf32>, vector<32x128xf32>, vector<2x128xf32> -> vector<2x128xf32>
      %98 = arith.addf %96, %97 : vector<2x128xf32>
      %cst_57 = arith.constant 5.000000e-01 : f32
      %99 = vector.broadcast %cst_57 : f32 to vector<2x128xf32>
      %100 = arith.mulf %99, %98 : vector<2x128xf32>
      %101 = math.tanh %100 : vector<2x128xf32>
      %cst_58 = arith.constant 1.000000e+00 : f32
      %102 = vector.broadcast %cst_58 : f32 to vector<2x128xf32>
      %103 = arith.addf %101, %102 : vector<2x128xf32>
      %cst_59 = arith.constant 5.000000e-01 : f32
      %104 = vector.broadcast %cst_59 : f32 to vector<2x128xf32>
      %105 = arith.mulf %104, %103 : vector<2x128xf32>
      %106 = math.tanh %98 : vector<2x128xf32>
      %107 = vector.extract_strided_slice %105 {offsets = [0, 0], sizes = [2, 32], strides = [1, 1]} : vector<2x128xf32> to vector<2x32xf32>
      %108 = vector.extract_strided_slice %105 {offsets = [0, 32], sizes = [2, 32], strides = [1, 1]} : vector<2x128xf32> to vector<2x32xf32>
      %109 = vector.extract_strided_slice %106 {offsets = [0, 64], sizes = [2, 32], strides = [1, 1]} : vector<2x128xf32> to vector<2x32xf32>
      %110 = vector.extract_strided_slice %105 {offsets = [0, 96], sizes = [2, 32], strides = [1, 1]} : vector<2x128xf32> to vector<2x32xf32>
      %111 = arith.mulf %108, %93 : vector<2x32xf32>
      %112 = arith.mulf %107, %109 : vector<2x32xf32>
      %113 = arith.addf %111, %112 : vector<2x32xf32>
      %114 = math.tanh %113 : vector<2x32xf32>
      %115 = arith.mulf %110, %114 : vector<2x32xf32>
      %116 = vector.extract_strided_slice %53 {offsets = [6, 0], sizes = [2, 128], strides = [1, 1]} : vector<16x128xf32> to vector<2x128xf32>
      %cst_60 = arith.constant dense<0.000000e+00> : vector<2x128xf32>
      %117 = tpu.matmul %115, %52, %cst_60 {dimension_numbers = #tpu.dot_dimension_numbers<[1], [0], [0], [1], [0, 0, 1, 1], [], []>} : vector<2x32xf32>, vector<32x128xf32>, vector<2x128xf32> -> vector<2x128xf32>
      %118 = arith.addf %116, %117 : vector<2x128xf32>
      %cst_61 = arith.constant 5.000000e-01 : f32
      %119 = vector.broadcast %cst_61 : f32 to vector<2x128xf32>
      %120 = arith.mulf %119, %118 : vector<2x128xf32>
      %121 = math.tanh %120 : vector<2x128xf32>
      %cst_62 = arith.constant 1.000000e+00 : f32
      %122 = vector.broadcast %cst_62 : f32 to vector<2x128xf32>
      %123 = arith.addf %121, %122 : vector<2x128xf32>
      %cst_63 = arith.constant 5.000000e-01 : f32
      %124 = vector.broadcast %cst_63 : f32 to vector<2x128xf32>
      %125 = arith.mulf %124, %123 : vector<2x128xf32>
      %126 = math.tanh %118 : vector<2x128xf32>
      %127 = vector.extract_strided_slice %125 {offsets = [0, 0], sizes = [2, 32], strides = [1, 1]} : vector<2x128xf32> to vector<2x32xf32>
      %128 = vector.extract_strided_slice %125 {offsets = [0, 32], sizes = [2, 32], strides = [1, 1]} : vector<2x128xf32> to vector<2x32xf32>
      %129 = vector.extract_strided_slice %126 {offsets = [0, 64], sizes = [2, 32], strides = [1, 1]} : vector<2x128xf32> to vector<2x32xf32>
      %130 = vector.extract_strided_slice %125 {offsets = [0, 96], sizes = [2, 32], strides = [1, 1]} : vector<2x128xf32> to vector<2x32xf32>
      %131 = arith.mulf %128, %113 : vector<2x32xf32>
      %132 = arith.mulf %127, %129 : vector<2x32xf32>
      %133 = arith.addf %131, %132 : vector<2x32xf32>
      %134 = math.tanh %133 : vector<2x32xf32>
      %135 = arith.mulf %130, %134 : vector<2x32xf32>
      %136 = vector.extract_strided_slice %53 {offsets = [8, 0], sizes = [2, 128], strides = [1, 1]} : vector<16x128xf32> to vector<2x128xf32>
      %cst_64 = arith.constant dense<0.000000e+00> : vector<2x128xf32>
      %137 = tpu.matmul %135, %52, %cst_64 {dimension_numbers = #tpu.dot_dimension_numbers<[1], [0], [0], [1], [0, 0, 1, 1], [], []>} : vector<2x32xf32>, vector<32x128xf32>, vector<2x128xf32> -> vector<2x128xf32>
      %138 = arith.addf %136, %137 : vector<2x128xf32>
      %cst_65 = arith.constant 5.000000e-01 : f32
      %139 = vector.broadcast %cst_65 : f32 to vector<2x128xf32>
      %140 = arith.mulf %139, %138 : vector<2x128xf32>
      %141 = math.tanh %140 : vector<2x128xf32>
      %cst_66 = arith.constant 1.000000e+00 : f32
      %142 = vector.broadcast %cst_66 : f32 to vector<2x128xf32>
      %143 = arith.addf %141, %142 : vector<2x128xf32>
      %cst_67 = arith.constant 5.000000e-01 : f32
      %144 = vector.broadcast %cst_67 : f32 to vector<2x128xf32>
      %145 = arith.mulf %144, %143 : vector<2x128xf32>
      %146 = math.tanh %138 : vector<2x128xf32>
      %147 = vector.extract_strided_slice %145 {offsets = [0, 0], sizes = [2, 32], strides = [1, 1]} : vector<2x128xf32> to vector<2x32xf32>
      %148 = vector.extract_strided_slice %145 {offsets = [0, 32], sizes = [2, 32], strides = [1, 1]} : vector<2x128xf32> to vector<2x32xf32>
      %149 = vector.extract_strided_slice %146 {offsets = [0, 64], sizes = [2, 32], strides = [1, 1]} : vector<2x128xf32> to vector<2x32xf32>
      %150 = vector.extract_strided_slice %145 {offsets = [0, 96], sizes = [2, 32], strides = [1, 1]} : vector<2x128xf32> to vector<2x32xf32>
      %151 = arith.mulf %148, %133 : vector<2x32xf32>
      %152 = arith.mulf %147, %149 : vector<2x32xf32>
      %153 = arith.addf %151, %152 : vector<2x32xf32>
      %154 = math.tanh %153 : vector<2x32xf32>
      %155 = arith.mulf %150, %154 : vector<2x32xf32>
      %156 = vector.extract_strided_slice %53 {offsets = [10, 0], sizes = [2, 128], strides = [1, 1]} : vector<16x128xf32> to vector<2x128xf32>
      %cst_68 = arith.constant dense<0.000000e+00> : vector<2x128xf32>
      %157 = tpu.matmul %155, %52, %cst_68 {dimension_numbers = #tpu.dot_dimension_numbers<[1], [0], [0], [1], [0, 0, 1, 1], [], []>} : vector<2x32xf32>, vector<32x128xf32>, vector<2x128xf32> -> vector<2x128xf32>
      %158 = arith.addf %156, %157 : vector<2x128xf32>
      %cst_69 = arith.constant 5.000000e-01 : f32
      %159 = vector.broadcast %cst_69 : f32 to vector<2x128xf32>
      %160 = arith.mulf %159, %158 : vector<2x128xf32>
      %161 = math.tanh %160 : vector<2x128xf32>
      %cst_70 = arith.constant 1.000000e+00 : f32
      %162 = vector.broadcast %cst_70 : f32 to vector<2x128xf32>
      %163 = arith.addf %161, %162 : vector<2x128xf32>
      %cst_71 = arith.constant 5.000000e-01 : f32
      %164 = vector.broadcast %cst_71 : f32 to vector<2x128xf32>
      %165 = arith.mulf %164, %163 : vector<2x128xf32>
      %166 = math.tanh %158 : vector<2x128xf32>
      %167 = vector.extract_strided_slice %165 {offsets = [0, 0], sizes = [2, 32], strides = [1, 1]} : vector<2x128xf32> to vector<2x32xf32>
      %168 = vector.extract_strided_slice %165 {offsets = [0, 32], sizes = [2, 32], strides = [1, 1]} : vector<2x128xf32> to vector<2x32xf32>
      %169 = vector.extract_strided_slice %166 {offsets = [0, 64], sizes = [2, 32], strides = [1, 1]} : vector<2x128xf32> to vector<2x32xf32>
      %170 = vector.extract_strided_slice %165 {offsets = [0, 96], sizes = [2, 32], strides = [1, 1]} : vector<2x128xf32> to vector<2x32xf32>
      %171 = arith.mulf %168, %153 : vector<2x32xf32>
      %172 = arith.mulf %167, %169 : vector<2x32xf32>
      %173 = arith.addf %171, %172 : vector<2x32xf32>
      %174 = math.tanh %173 : vector<2x32xf32>
      %175 = arith.mulf %170, %174 : vector<2x32xf32>
      %176 = vector.extract_strided_slice %53 {offsets = [12, 0], sizes = [2, 128], strides = [1, 1]} : vector<16x128xf32> to vector<2x128xf32>
      %cst_72 = arith.constant dense<0.000000e+00> : vector<2x128xf32>
      %177 = tpu.matmul %175, %52, %cst_72 {dimension_numbers = #tpu.dot_dimension_numbers<[1], [0], [0], [1], [0, 0, 1, 1], [], []>} : vector<2x32xf32>, vector<32x128xf32>, vector<2x128xf32> -> vector<2x128xf32>
      %178 = arith.addf %176, %177 : vector<2x128xf32>
      %cst_73 = arith.constant 5.000000e-01 : f32
      %179 = vector.broadcast %cst_73 : f32 to vector<2x128xf32>
      %180 = arith.mulf %179, %178 : vector<2x128xf32>
      %181 = math.tanh %180 : vector<2x128xf32>
      %cst_74 = arith.constant 1.000000e+00 : f32
      %182 = vector.broadcast %cst_74 : f32 to vector<2x128xf32>
      %183 = arith.addf %181, %182 : vector<2x128xf32>
      %cst_75 = arith.constant 5.000000e-01 : f32
      %184 = vector.broadcast %cst_75 : f32 to vector<2x128xf32>
      %185 = arith.mulf %184, %183 : vector<2x128xf32>
      %186 = math.tanh %178 : vector<2x128xf32>
      %187 = vector.extract_strided_slice %185 {offsets = [0, 0], sizes = [2, 32], strides = [1, 1]} : vector<2x128xf32> to vector<2x32xf32>
      %188 = vector.extract_strided_slice %185 {offsets = [0, 32], sizes = [2, 32], strides = [1, 1]} : vector<2x128xf32> to vector<2x32xf32>
      %189 = vector.extract_strided_slice %186 {offsets = [0, 64], sizes = [2, 32], strides = [1, 1]} : vector<2x128xf32> to vector<2x32xf32>
      %190 = vector.extract_strided_slice %185 {offsets = [0, 96], sizes = [2, 32], strides = [1, 1]} : vector<2x128xf32> to vector<2x32xf32>
      %191 = arith.mulf %188, %173 : vector<2x32xf32>
      %192 = arith.mulf %187, %189 : vector<2x32xf32>
      %193 = arith.addf %191, %192 : vector<2x32xf32>
      %194 = math.tanh %193 : vector<2x32xf32>
      %195 = arith.mulf %190, %194 : vector<2x32xf32>
      %196 = vector.extract_strided_slice %53 {offsets = [14, 0], sizes = [2, 128], strides = [1, 1]} : vector<16x128xf32> to vector<2x128xf32>
      %cst_76 = arith.constant dense<0.000000e+00> : vector<2x128xf32>
      %197 = tpu.matmul %195, %52, %cst_76 {dimension_numbers = #tpu.dot_dimension_numbers<[1], [0], [0], [1], [0, 0, 1, 1], [], []>} : vector<2x32xf32>, vector<32x128xf32>, vector<2x128xf32> -> vector<2x128xf32>
      %198 = arith.addf %196, %197 : vector<2x128xf32>
      %cst_77 = arith.constant 5.000000e-01 : f32
      %199 = vector.broadcast %cst_77 : f32 to vector<2x128xf32>
      %200 = arith.mulf %199, %198 : vector<2x128xf32>
      %201 = math.tanh %200 : vector<2x128xf32>
      %cst_78 = arith.constant 1.000000e+00 : f32
      %202 = vector.broadcast %cst_78 : f32 to vector<2x128xf32>
      %203 = arith.addf %201, %202 : vector<2x128xf32>
      %cst_79 = arith.constant 5.000000e-01 : f32
      %204 = vector.broadcast %cst_79 : f32 to vector<2x128xf32>
      %205 = arith.mulf %204, %203 : vector<2x128xf32>
      %206 = math.tanh %198 : vector<2x128xf32>
      %207 = vector.extract_strided_slice %205 {offsets = [0, 0], sizes = [2, 32], strides = [1, 1]} : vector<2x128xf32> to vector<2x32xf32>
      %208 = vector.extract_strided_slice %205 {offsets = [0, 32], sizes = [2, 32], strides = [1, 1]} : vector<2x128xf32> to vector<2x32xf32>
      %209 = vector.extract_strided_slice %206 {offsets = [0, 64], sizes = [2, 32], strides = [1, 1]} : vector<2x128xf32> to vector<2x32xf32>
      %210 = vector.extract_strided_slice %205 {offsets = [0, 96], sizes = [2, 32], strides = [1, 1]} : vector<2x128xf32> to vector<2x32xf32>
      %211 = arith.mulf %208, %193 : vector<2x32xf32>
      %212 = arith.mulf %207, %209 : vector<2x32xf32>
      %213 = arith.addf %211, %212 : vector<2x32xf32>
      %214 = math.tanh %213 : vector<2x32xf32>
      %215 = arith.mulf %210, %214 : vector<2x32xf32>
      %c0_80 = arith.constant 0 : index
      %c0_81 = arith.constant 0 : index
      %216 = vector.load %arg9[%c0_80, %c0_81] : memref<32x1xf32, #tpu.memory_space<vmem>>, vector<32x1xf32>
      %cst_82 = arith.constant dense<0.000000e+00> : vector<2x1xf32>
      %217 = tpu.matmul %215, %216, %cst_82 {dimension_numbers = #tpu.dot_dimension_numbers<[1], [0], [0], [1], [0, 0, 1, 1], [], []>} : vector<2x32xf32>, vector<32x1xf32>, vector<2x1xf32> -> vector<2x1xf32>
      %c0_83 = arith.constant 0 : index
      %c0_84 = arith.constant 0 : index
      %218 = vector.load %arg10[%c0_83, %c0_84] : memref<1x1xf32, #tpu.memory_space<vmem>>, vector<1x1xf32>
      %219 = vector.broadcast %218 : vector<1x1xf32> to vector<2x1xf32>
      %220 = arith.addf %217, %219 : vector<2x1xf32>
      %c0_85 = arith.constant 0 : index
      %c0_86 = arith.constant 0 : index
      %221 = vector.load %arg11[%c0_85, %c0_86] : memref<2x1xf32, #tpu.memory_space<vmem>>, vector<2x1xf32>
      tpu.vector_store %arg11[%c0_85, %c0_86], %220 {strides = array<i32>} : memref<2x1xf32, #tpu.memory_space<vmem>>, vector<2x1xf32>,
    } else {
    }
    return
  }
  func.func @transform_0(%arg0: i32) -> (i32, i32, i32) {
    %c0_i32 = arith.constant 0 : i32
    %c0_i32_0 = arith.constant 0 : i32
    %c0_i32_1 = arith.constant 0 : i32
    return %arg0, %c0_i32, %c0_i32_0 : i32, i32, i32
  }
  func.func @transform_1(%arg0: i32) -> (i32, i32) {
    %c0_i32 = arith.constant 0 : i32
    %c0_i32_0 = arith.constant 0 : i32
    %c0_i32_1 = arith.constant 0 : i32
    return %c0_i32, %c0_i32_0 : i32, i32
  }
  func.func @transform_2(%arg0: i32) -> (i32, i32) {
    %c0_i32 = arith.constant 0 : i32
    %c0_i32_0 = arith.constant 0 : i32
    %c0_i32_1 = arith.constant 0 : i32
    return %c0_i32, %c0_i32_0 : i32, i32
  }
  func.func @transform_3(%arg0: i32) -> (i32, i32) {
    %c0_i32 = arith.constant 0 : i32
    %c0_i32_0 = arith.constant 0 : i32
    %c0_i32_1 = arith.constant 0 : i32
    return %c0_i32, %c0_i32_0 : i32, i32
  }
  func.func @transform_4(%arg0: i32) -> (i32, i32) {
    %c0_i32 = arith.constant 0 : i32
    %c0_i32_0 = arith.constant 0 : i32
    %c0_i32_1 = arith.constant 0 : i32
    return %c0_i32, %c0_i32_0 : i32, i32
  }
  func.func @transform_5(%arg0: i32) -> (i32, i32) {
    %c0_i32 = arith.constant 0 : i32
    %c0_i32_0 = arith.constant 0 : i32
    %c0_i32_1 = arith.constant 0 : i32
    return %c0_i32, %c0_i32_0 : i32, i32
  }
  func.func @transform_6(%arg0: i32) -> (i32, i32) {
    %c0_i32 = arith.constant 0 : i32
    %c0_i32_0 = arith.constant 0 : i32
    %c0_i32_1 = arith.constant 0 : i32
    return %c0_i32, %c0_i32_0 : i32, i32
  }
  func.func @transform_7(%arg0: i32) -> (i32, i32) {
    %c0_i32 = arith.constant 0 : i32
    %c0_i32_0 = arith.constant 0 : i32
    %c0_i32_1 = arith.constant 0 : i32
    return %c0_i32, %c0_i32_0 : i32, i32
  }
  func.func @transform_8(%arg0: i32) -> (i32, i32) {
    %c0_i32 = arith.constant 0 : i32
    %c0_i32_0 = arith.constant 0 : i32
    %c0_i32_1 = arith.constant 0 : i32
    return %c0_i32, %c0_i32_0 : i32, i32
  }
  func.func @transform_9(%arg0: i32) -> (i32, i32) {
    %c0_i32 = arith.constant 0 : i32
    %c0_i32_0 = arith.constant 0 : i32
    %c0_i32_1 = arith.constant 0 : i32
    return %c0_i32, %c0_i32_0 : i32, i32
  }
  func.func @transform_10(%arg0: i32) -> (i32, i32) {
    %c0_i32 = arith.constant 0 : i32
    %c0_i32_0 = arith.constant 0 : i32
    %c0_i32_1 = arith.constant 0 : i32
    return %c0_i32, %c0_i32_0 : i32, i32
  }
}

</mosaic_0001>

<bundles_post_ra>
// kernel: tpu_custom_call.1
= control target key start
LH: loop header
LB: loop body
LE: loop exit
PB: predicated region body
PF: predicated region fallthrough
CT: control target
= control target key end

     0   :  { %s4341_s0 = inlined_call_operand.vmem [shape: f32[16,18,16], index: 0, kind: input, shape index: {}]   ;;  %s4342_s1 = inlined_call_operand.vmem [shape: f32[48,128], index: 1, kind: input, shape index: {}]   ;;  %s4343_s2 = inlined_call_operand.vmem [shape: f32[1,128], index: 2, kind: input, shape index: {}]   ;;  %s4344_s3 = inlined_call_operand.hbm [shape: f32[384,256], index: 3, kind: input, shape index: {}]   ;;  %s4345_s4 = inlined_call_operand.vmem [shape: f32[1,256], index: 4, kind: input, shape index: {}]   ;;  %s4346_s5 = inlined_call_operand.vmem [shape: f32[256,128], index: 5, kind: input, shape index: {}]   ;;  %s4347_s6 = inlined_call_operand.vmem [shape: f32[1,128], index: 6, kind: input, shape index: {}]   ;;  %s4348_s7 = inlined_call_operand.vmem [shape: f32[32,128], index: 7, kind: input, shape index: {}]   ;;  %s4349_s8 = inlined_call_operand.vmem [shape: f32[32,1], index: 8, kind: input, shape index: {}]   ;;  %s4350_s9 = inlined_call_operand.<no memory space> [shape: f32[1,1], index: 9, kind: input, shape index: {}]   ;;  %s4351_s10 = inlined_call_operand.vmem [shape: f32[2,1], index: 10, kind: output, shape index: {}]  }
   0x1   :  { %v15_v0 = vstv %s4350_s9 }
   0x2   :  { %16 = vst [vmem:[#allocation4] sm:$0x1] %v15_v0 }
   0x3   :  { %17 = vsyncpa [#allocation6], 0  ;;  %s3581_s15 = smov 0  }
   0x4 LB: > { %s3587_s16 = sadd.s32 4294967295, %s3509_s15   ;;  %p2810_p0 = scmp.ge.s32.totalorder %s3509_s15, 1  ;;  %s3509_s15 = sphi %s3581_s15, %s23_s15  }
   0x5   : > { %p264_p1 = scmp.lt.s32.totalorder %s3509_s15, 3  ;;  %s3511_s9 = smov [#allocation5]  }
   0x6   : > { %s282_s17 = sshll.u32 %s3511_s9, 4  ;;  %p4352_p4 = scmp.eq.s32.totalorder %s3587_s16, 0  ;;  %s283_s17 = int_to_ptr.vmem [resolvable:$true] %s282_s17 }
   0x7   : > { %p3592_p3 = pnand %p2810_p0, %p264_p1  ;;  %s3471_s22 = scalar_lea.hbm %s4344_s3, 12288 }
   0x8   : > { %p3472_p7 = scmp.ne.s32.totalorder %s4344_s3, %s3471_s22  ;;  %p3478_p11 = scmp.lt.u32.totalorder %s3471_s22, %s4344_s3 }
   0x9   : > { %s4354_s18 = scalar_select %p3592_p3, 1, 0 }
   0xa   : > { %p3397_p5 = pneg %p3592_p3 }
   0xc   : > { %p3601_p6 = pnand %p4352_p4, %p3397_p5 }
   0xe   : > { %p3473_p8 = pneg %p3601_p6 }
  0x10   : > { %p3474_p9 = pnand %p3473_p8, %p3472_p7 }
  0x12   : > { %p3475_p10 = pneg %p3474_p9 }
  0x14   : > { %p3480_p12 = pnand %p3478_p11, %p3475_p10 }
  0x16   : > { %3483 = shalt.err (!%p3480_p12)
}
  0x17   : > { %s3484_s27 = scalar_lea.vmem %s283_s17, 12288  ;;  %p3492_p5 = scmp.lt.s32.totalorder %s283_s17, %s283_s17 }
  0x18   : > { %p3485_p13 = scmp.ne.s32.totalorder %s283_s17, %s3484_s27  ;;  %p3493_p2 = scmp.lt.s32.totalorder %s3484_s27, %s3484_s27 }
  0x1a   : > { %p3487_p0 = pnand %p3485_p13, %p3473_p8  ;;  %p3494_p4 = por %p3493_p2, %p3492_p5 }
  0x1c   : > { %p3488_p1 = pneg %p3487_p0 }
  0x1e   : > { %p3495_p3 = pnand %p3494_p4, %p3488_p1 }
  0x20   : > { %3498 = shalt.err (!%p3495_p3)
}
  0x21   : > { %s3512_s28 = smov 256   ;;  %s3513_s29 = smov 16  }
  0x22   : > { %3400 = dma.hbm_to_vmem [thread:$0]  (!%p3601_p6), %s4344_s3, 12288, %s283_s17, [#allocation6], %s3512_s28, %s3512_s28, %s3513_s29  }
  0x23   : > { %p4356_p7 = scmp.ne.s32.totalorder %s4354_s18, 0 }
  0x24   : > { %p4357_p9 = scmp.eq.s32.totalorder (!%p4356_p7), %s3587_s16, 0 }
  0x25   : > { %326 = sbr.rel (%p4356_p7) target bundleno = 6625 (0x19e1), region = 60 }
  0x2c   : > { %3504 = dma.done.wait (%p4357_p9), [#allocation6], 12288   ;;  %p4358_p8 = pmov %p4357_p9 }
  0x2d   : > { %s3628_s12 = sshll.u32 %s3587_s16, 3  ;;  %p4359_p3 = scmp.ne.s32.totalorder %s3587_s16, 0 }
  0x2e   : > { %3506 = vsyncadd (%p4358_p8), [#allocation6], 4294955008  ;;  %p361_p2 = scmp.lt.s32.totalorder %s3628_s12, 15  ;;  %v3514_v1 = vmov (!%p4359_p3), 0.0  }
  0x2f   : > { %370 = sbr.rel (%p4359_p3) target bundleno = 60 (0x3c), region = 68  ;;  %371 = vst [vmem:[#allocation2] sm:$0xff] (!%p4359_p3), %v3514_v1  ;;  %372 = vst [vmem:[#allocation2 + $0x8] sm:$0xff] (!%p4359_p3), %v3514_v1 }
  0x30   : > { %s362_s13 = scalar_select %p361_p2, %s3628_s12, 15 }
  0x31   : > { %373 = vst [vmem:[#allocation2 + $0x10] sm:$0x3] (!%p4359_p3), %v3514_v1  ;;  %374 = vst [vmem:[#allocation2 + $0x18] sm:$0xff] (!%p4359_p3), %v3514_v1 }
  0x32   : > { %s3392_s14 = smul.u32 24, %s362_s13  ;;  %375 = vst [vmem:[#allocation2 + $0x20] sm:$0xff] (!%p4359_p3), %v3514_v1  ;;  %376 = vst [vmem:[#allocation2 + $0x28] sm:$0x3] (!%p4359_p3), %v3514_v1 }
  0x33   : > { %377 = vst [vmem:[#allocation2 + $0x30] sm:$0xff] (!%p4359_p3), %v3514_v1  ;;  %378 = vst [vmem:[#allocation2 + $0x38] sm:$0xff] (!%p4359_p3), %v3514_v1 }
  0x34   : > { %s3635_s17 = scalar_lea.vmem %s4341_s0, %s3392_s14  ;;  %379 = vst [vmem:[#allocation2 + $0x40] sm:$0x3] (!%p4359_p3), %v3514_v1  ;;  %380 = vst [vmem:[#allocation2 + $0x48] sm:$0xff] (!%p4359_p3), %v3514_v1 }
  0x35   : > { %381 = vst [vmem:[#allocation2 + $0x50] sm:$0xff] (!%p4359_p3), %v3514_v1  ;;  %382 = vst [vmem:[#allocation2 + $0x58] sm:$0x3] (!%p4359_p3), %v3514_v1 }
  0x36   : > { %383 = vst [vmem:[#allocation2 + $0x60] sm:$0xff] %v3514_v1  ;;  %384 = vst [vmem:[#allocation2 + $0x68] sm:$0xff] %v3514_v1 }
  0x37   : > { %385 = vst [vmem:[#allocation2 + $0x70] sm:$0x3] %v3514_v1  ;;  %386 = vst [vmem:[#allocation2 + $0x78] sm:$0xff] %v3514_v1 }
  0x38   : > { %387 = vst [vmem:[#allocation2 + $0x80] sm:$0xff] %v3514_v1  ;;  %388 = vst [vmem:[#allocation2 + $0x88] sm:$0x3] %v3514_v1 }
  0x39   : > { %389 = vst [vmem:[#allocation2 + $0x90] sm:$0xff] %v3514_v1  ;;  %390 = vst [vmem:[#allocation2 + $0x98] sm:$0xff] %v3514_v1 }
  0x3a   : > { %391 = vst [vmem:[#allocation2 + $0xa0] sm:$0x3] %v3514_v1  ;;  %392 = vst [vmem:[#allocation2 + $0xa8] sm:$0xff] %v3514_v1 }
  0x3b   : > { %393 = vst [vmem:[#allocation2 + $0xb0] sm:$0xff] %v3514_v1  ;;  %394 = vst [vmem:[#allocation2 + $0xb8] sm:$0x3] %v3514_v1 }
  0x3c PF: > { %v427_v2 = vld [vmem:[%s3635_s17 + $0x2] sm:$0xff]  ;;  %s3515_s18 = smov 32   ;;  %s3516_s20 = smov 16   ;;  %v428_v4 = vld [vmem:[%s3635_s17 + $0xa] sm:$0xff]  ;;  %v413_v7 = vld [vmem:[%s3635_s17 + $0x19] sm:$0xff]  ;;  %vm571_vm0 = vcmask 130048  }
  0x3d   : > { %v411_v3 = vld [vmem:[%s3635_s17 + $0x1] sm:$0xff]  ;;  %523 = vrot.lane.b32.xlu1 %v427_v2, %s3515_s18  ;;  %v412_v5 = vld [vmem:[%s3635_s17 + $0x9] sm:$0xff]  ;;  %v608_v13 = vld [vmem:[%s4342_s1 + $0x18] sm:$0xff]  ;;  %vm588_vm1 = vcmask 261120   ;;  %vm618_vm2 = vcmask 392192   ;;  %vm1746_vm3 = vcmask 1041409  }
  0x3e   : > { %459 = vrot.lane.b32.xlu0 %v411_v3, %s3516_s20  ;;  %v414_v6 = vld [vmem:[%s3635_s17 + $0x21] sm:$0xff]  ;;  %v607_v12 = vld [vmem:[%s4342_s1 + $0x10] sm:$0xff]  ;;  %v416_v15 = vld [vmem:[%s3635_s17 + $0x39] sm:$0xff]  ;;  %vm1748_vm4 = vcmask 1042434   ;;  %vm1750_vm5 = vcmask 1043459   ;;  %vm1752_vm6 = vcmask 1044484  }
  0x3f   : > { %v430_v8 = vld [vmem:[%s3635_s17 + $0x22] sm:$0xff]  ;;  %v429_v9 = vld [vmem:[%s3635_s17 + $0x1a] sm:$0xff]  ;;  %v415_v16 = vld [vmem:[%s3635_s17 + $0x31] sm:$0xff]  ;;  %v3090_v17 = vpack.c.bf16 %v608_v13, %v607_v12  ;;  %vm1754_vm7 = vcmask 1045509   ;;  %vm1756_vm8 = vcmask 1046534   ;;  %vm1758_vm9 = vcmask 1047559  }
  0x40   : > { %v605_v10 = vld [vmem:[%s4342_s1] sm:$0xff]  ;;  %v606_v11 = vld [vmem:[%s4342_s1 + $0x8] sm:$0xff]  ;;  %v431_v21 = vld [vmem:[%s3635_s17 + $0x32] sm:$0xff]  ;;  %s1840_s11 = scalar_lea.vmem [#allocation3], %s3628_s12  ;;  %p2837_p4 = scmp.ne.s32.totalorder %s3587_s16, 1 }
  0x41   : > { %525 = vrot.lane.b32.xlu1 %v428_v4, %s3515_s18  ;;  %v3086_v14 = vpack.c.bf16 %v606_v11, %v605_v10  ;;  %v609_v18 = vld [vmem:[%s4342_s1 + $0x20] sm:$0xff]  ;;  %v610_v19 = vld [vmem:[%s4342_s1 + $0x28] sm:$0xff]  ;;  %v418_v23 = vld [vmem:[%s3635_s17 + $0x51] sm:$0xff]  ;;  %vm3519_vm10 = vmmov (!%p2837_p4), 0   ;;  %s3522_s21 = smov (!%p2837_p4), 32   ;;  %vm2765_vm11 = vcmask (!%p2837_p4), 1024  }
  0x42   : > { %461 = vrot.lane.b32.xlu0 %v412_v5, %s3516_s20  ;;  %v432_v20 = vld [vmem:[%s3635_s17 + $0x3a] sm:$0xff]  ;;  %v3094_v22 = vpack.c.bf16 %v610_v19, %v609_v18  ;;  %v417_v24 = vld [vmem:[%s3635_s17 + $0x49] sm:$0xff]  ;;  %v434_v25 = vld [vmem:[%s3635_s17 + $0x52] sm:$0xff] }
  0x43   : > { %3087 = vmatprep.subr.bf16.mxu1 %v3086_v14  ;;  %v433_v26 = vld [vmem:[%s3635_s17 + $0x4a] sm:$0xff]  ;;  %v419_v28 = vld [vmem:[%s3635_s17 + $0x61] sm:$0xff]  ;;  %v421_v32 = vld [vmem:[%s3635_s17 + $0x79] sm:$0xff] }
  0x44   : > { %3089 = vmatpush3.bf16.msra.mxu1 %v3086_v14  ;;  %v420_v27 = vld [vmem:[%s3635_s17 + $0x69] sm:$0xff]  ;;  %v422_v31 = vld [vmem:[%s3635_s17 + $0x81] sm:$0xff]  ;;  %v424_v35 = vld [vmem:[%s3635_s17 + $0x99] sm:$0xff] }
  0x45   : > { %465 = vrot.lane.b32.xlu1 %v414_v6, %s3516_s20  ;;  %3091 = vmatprep.subr.bf16.mxu1 %v3090_v17  ;;  %v436_v29 = vld [vmem:[%s3635_s17 + $0x6a] sm:$0xff]  ;;  %v435_v30 = vld [vmem:[%s3635_s17 + $0x62] sm:$0xff]  ;;  %v437_v34 = vld [vmem:[%s3635_s17 + $0x7a] sm:$0xff] }
  0x46   : > { %463 = vrot.lane.b32.xlu0 %v413_v7, %s3516_s20  ;;  %v438_v33 = vld [vmem:[%s3635_s17 + $0x82] sm:$0xff]  ;;  %v423_v36 = vld [vmem:[%s3635_s17 + $0x91] sm:$0xff]  ;;  %v440_v37 = vld [vmem:[%s3635_s17 + $0x9a] sm:$0xff] }
  0x47   : > { %v439_v38 = vld [vmem:[%s3635_s17 + $0x92] sm:$0xff]  ;;  %v863_v40 = vld [vmem:[#allocation5 + $0x18] sm:$0xff]  ;;  %v862_v43 = vld [vmem:[#allocation5 + $0x10] sm:$0xff] }
  0x48   : > { %3093 = vmatpush3.bf16.msra.mxu1 %v3090_v17  ;;  %v861_v39 = vld [vmem:[#allocation5 + $0x8] sm:$0xff]  ;;  %v860_v41 = vld [vmem:[#allocation5] sm:$0xff]  ;;  %v867_v45 = vld [vmem:[#allocation5 + $0x38] sm:$0xff] }
  0x49   : > { %529 = vrot.lane.b32.xlu1 %v430_v8, %s3515_s18  ;;  %3095 = vmatprep.subr.bf16.mxu1 %v3094_v22  ;;  %v3098_v42 = vpack.c.bf16 %v863_v40, %v861_v39  ;;  %v865_v44 = vld [vmem:[#allocation5 + $0x28] sm:$0xff]  ;;  %v3100_v46 = vpack.c.bf16 %v862_v43, %v860_v41  ;;  %v864_v48 = vld [vmem:[#allocation5 + $0x20] sm:$0xff]  ;;  %v866_v49 = vld [vmem:[#allocation5 + $0x30] sm:$0xff] }
  0x4a   : > { %527 = vrot.lane.b32.xlu0 %v429_v9, %s3515_s18  ;;  %v3102_v47 = vpack.c.bf16 %v867_v45, %v865_v44  ;;  %v869_v50 = vld [vmem:[#allocation5 + $0x48] sm:$0xff]  ;;  %v871_v51 = vld [vmem:[#allocation5 + $0x58] sm:$0xff]  ;;  %v426_v52 = vld [vmem:[%s3635_s17 + $0xb1] sm:$0xff]  ;;  %v3104_v54 = vpack.c.bf16 %v866_v49, %v864_v48 }
  0x4b   : > { %v425_v53 = vld [vmem:[%s3635_s17 + $0xa9] sm:$0xff]  ;;  %3099 = vmatprep.subr.bf16.mxu0 %v3098_v42  ;;  %v3106_v55 = vpack.c.bf16 %v871_v51, %v869_v50  ;;  %v868_v56 = vld [vmem:[#allocation5 + $0x40] sm:$0xff]  ;;  %v870_v57 = vld [vmem:[#allocation5 + $0x50] sm:$0xff] }
  0x4c   : > { %3097 = vmatpush3.bf16.msra.mxu1 %v3094_v22  ;;  %3101 = vmatpush1.bf16.msra.mxu0 %v3100_v46  ;;  %v873_v58 = vld [vmem:[#allocation5 + $0x68] sm:$0xff]  ;;  %v875_v59 = vld [vmem:[#allocation5 + $0x78] sm:$0xff]  ;;  %v3108_v62 = vpack.c.bf16 %v870_v57, %v868_v56  ;;  %v872_v0 = vld [vmem:[#allocation5 + $0x60] sm:$0xff] }
  0x4d   : > { %469 = vrot.lane.b32.xlu1 %v416_v15, %s3516_s20  ;;  %3103 = vmatprep.subr.bf16.mxu0 %v3102_v47  ;;  %v442_v60 = vld [vmem:[%s3635_s17 + $0xb2] sm:$0xff]  ;;  %v441_v61 = vld [vmem:[%s3635_s17 + $0xaa] sm:$0xff]  ;;  %v3110_v63 = vpack.c.bf16 %v875_v59, %v873_v58  ;;  %v874_v1 = vld [vmem:[#allocation5 + $0x70] sm:$0xff] }
  0x4e   : > { %467 = vrot.lane.b32.xlu0 %v415_v16, %s3516_s20  ;;  %v877_v2 = vld [vmem:[#allocation5 + $0x88] sm:$0xff]  ;;  %v879_v3 = vld [vmem:[#allocation5 + $0x98] sm:$0xff]  ;;  %v3112_v4 = vpack.c.bf16 %v874_v1, %v872_v0  ;;  %v876_v6 = vld [vmem:[#allocation5 + $0x80] sm:$0xff] }
  0x4f   : > { %v3114_v5 = vpack.c.bf16 %v879_v3, %v877_v2  ;;  %v878_v7 = vld [vmem:[#allocation5 + $0x90] sm:$0xff]  ;;  %v397_v22 = vld [vmem:[%s3635_s17 + $0x18] sm:$0xff]  ;;  %v402_v41 = vld [vmem:[%s3635_s17 + $0x50] sm:$0xff] }
  0x50   : > { %3105 = vmatpush1.bf16.msra.mxu0 %v3104_v54  ;;  %v3116_v8 = vpack.c.bf16 %v878_v7, %v876_v6  ;;  %v395_v9 = vld [vmem:[%s3635_s17] sm:$0xff]  ;;  %v396_v14 = vld [vmem:[%s3635_s17 + $0x8] sm:$0xff]  ;;  %v408_v7 = vld [vmem:[%s3635_s17 + $0x98] sm:$0xff] }
  0x51   : > { %533 = vrot.lane.b32.xlu1 %v432_v20, %s3515_s18  ;;  %3107 = vmatprep.subr.bf16.mxu0 %v3106_v55  ;;  %v401_v42 = vld [vmem:[%s3635_s17 + $0x48] sm:$0xff] }
  0x52   : > { %531 = vrot.lane.b32.xlu0 %v431_v21, %s3515_s18  ;;  %v398_v21 = vld [vmem:[%s3635_s17 + $0x20] sm:$0xff]  ;;  %v404_v51 = vld [vmem:[%s3635_s17 + $0x68] sm:$0xff] }
  0x54   : > { %3109 = vmatpush1.bf16.msra.mxu0 %v3108_v62  ;;  %v405_v62 = vld [vmem:[%s3635_s17 + $0x78] sm:$0xff] }
  0x55   : > { %473 = vrot.lane.b32.xlu1 %v418_v23, %s3516_s20  ;;  %3111 = vmatprep.subr.bf16.mxu0 %v3110_v63 }
  0x56   : > { %471 = vrot.lane.b32.xlu0 %v417_v24, %s3516_s20 }
  0x58   : > { %3113 = vmatpush1.bf16.msra.mxu0 %v3112_v4 }
  0x59   : > { %537 = vrot.lane.b32.xlu1 %v434_v25, %s3515_s18  ;;  %3115 = vmatprep.subr.bf16.mxu0 %v3114_v5 }
  0x5a   : > { %535 = vrot.lane.b32.xlu0 %v433_v26, %s3515_s18 }
  0x5c   : > { %3117 = vmatpush1.bf16.msra.mxu0 %v3116_v8  ;;  %v407_v8 = vld [vmem:[%s3635_s17 + $0x90] sm:$0xff] }
  0x5d   : > { %477 = vrot.lane.b32.xlu1 %v420_v27, %s3516_s20 }
  0x5e   : > { %475 = vrot.lane.b32.xlu0 %v419_v28, %s3516_s20 }
  0x61   : > { %541 = vrot.lane.b32.xlu1 %v436_v29, %s3515_s18 }
  0x62   : > { %539 = vrot.lane.b32.xlu0 %v435_v30, %s3515_s18 }
  0x65   : > { %481 = vrot.lane.b32.xlu1 %v422_v31, %s3516_s20  ;;  %v400_v31 = vld [vmem:[%s3635_s17 + $0x38] sm:$0xff] }
  0x66   : > { %479 = vrot.lane.b32.xlu0 %v421_v32, %s3516_s20  ;;  %v399_v32 = vld [vmem:[%s3635_s17 + $0x30] sm:$0xff] }
  0x69   : > { %545 = vrot.lane.b32.xlu1 %v438_v33, %s3515_s18 }
  0x6a   : > { %543 = vrot.lane.b32.xlu0 %v437_v34, %s3515_s18 }
  0x6d   : > { %485 = vrot.lane.b32.xlu1 %v424_v35, %s3516_s20 }
  0x6e   : > { %483 = vrot.lane.b32.xlu0 %v423_v36, %s3516_s20 }
  0x71   : > { %549 = vrot.lane.b32.xlu1 %v440_v37, %s3515_s18 }
  0x72   : > { %547 = vrot.lane.b32.xlu0 %v439_v38, %s3515_s18 }
  0x75   : > { %489 = vrot.lane.b32.xlu1 %v426_v52, %s3516_s20  ;;  %v403_v52 = vld [vmem:[%s3635_s17 + $0x60] sm:$0xff] }
  0x76   : > { %487 = vrot.lane.b32.xlu0 %v425_v53, %s3516_s20  ;;  %s3521_s20 = smov (!%p2837_p4), 64  }
  0x79   : > { %553 = vrot.lane.b32.xlu1 %v442_v60, %s3515_s18 }
  0x7a   : > { %551 = vrot.lane.b32.xlu0 %v441_v61, %s3515_s18  ;;  %v406_v61 = vld [vmem:[%s3635_s17 + $0x80] sm:$0xff] }
  0xaf   : > { %v524_v10 = vpop.permute.xlu1 %523 }
  0xb0   : > { %v460_v11 = vpop.permute.xlu0 %459 }
  0xb1   : > { %v572_v12 = vsel %vm571_vm0, %v395_v9, %v460_v11 }
  0xb2   : > { %v589_v13 = vsel %vm588_vm1, %v572_v12, %v524_v10 }
  0xb3   : > { %2963 = vmatprep.mubr.msk.f32.mxu1 %vm618_vm2, %v589_v13  ;;  %v526_v15 = vpop.permute.xlu1 %525 }
  0xb4   : > { %v462_v16 = vpop.permute.xlu0 %461 }
  0xb5   : > { %v573_v17 = vsel %vm571_vm0, %v396_v14, %v462_v16 }
  0xb6   : > { %v590_v18 = vsel %vm588_vm1, %v573_v17, %v526_v15  ;;  %v410_v17 = vld [vmem:[%s3635_s17 + $0xb0] sm:$0xff] }
  0xb7   : > { %2964 = vmatmul.mubr.msk.f32.vlgmr.msra.gmra.mrb[0].mxu1 %vm618_vm2, %v590_v18  ;;  %v466_v19 = vpop.permute.xlu1 %465  ;;  %v409_v18 = vld [vmem:[%s3635_s17 + $0xa8] sm:$0xff] }
  0xb8   : > { %v464_v20 = vpop.permute.xlu0 %463  ;;  %v575_v23 = vsel %vm571_vm0, %v398_v21, %v466_v19 }
  0xb9   : > { %v574_v24 = vsel %vm571_vm0, %v397_v22, %v464_v20 }
  0xbb   : > { %v530_v25 = vpop.permute.xlu1 %529 }
  0xbc   : > { %v528_v26 = vpop.permute.xlu0 %527  ;;  %v592_v27 = vsel %vm588_vm1, %v575_v23, %v530_v25  ;;  %v881_v25 = vld [vmem:[#allocation5 + $0xa8] sm:$0xff] }
  0xbd   : > { %v591_v28 = vsel %vm588_vm1, %v574_v24, %v528_v26  ;;  %v883_v26 = vld [vmem:[#allocation5 + $0xb8] sm:$0xff] }
  0xbe   : > { %2966 = vmatprep.mubr.msk.f32.mxu1 %vm618_vm2, %v591_v28  ;;  %v880_v28 = vld [vmem:[#allocation5 + $0xa0] sm:$0xff] }
  0xbf   : > { %2967 = vmatmul.mubr.msk.f32.gmra.mrb[2].mxu1 %vm618_vm2, %v592_v27  ;;  %v470_v29 = vpop.permute.xlu1 %469  ;;  %v3118_v27 = vpack.c.bf16 %v883_v26, %v881_v25  ;;  %v1109_v25 = vld [vmem:[#allocation5 + $0x1e0] sm:$0xff]  ;;  %v1111_v26 = vld [vmem:[#allocation5 + $0x1f0] sm:$0xff] }
  0xc0   : > { %v468_v30 = vpop.permute.xlu0 %467  ;;  %v577_v33 = vsel %vm571_vm0, %v400_v31, %v470_v29  ;;  %v882_v29 = vld [vmem:[#allocation5 + $0xb0] sm:$0xff]  ;;  %v885_v31 = vld [vmem:[#allocation5 + $0xc8] sm:$0xff] }
  0xc1   : > { %v576_v34 = vsel %vm571_vm0, %v399_v32, %v468_v30  ;;  %v3120_v30 = vpack.c.bf16 %v882_v29, %v880_v28  ;;  %3119 = vmatprep.subr.bf16.mxu0 %v3118_v27  ;;  %v887_v32 = vld [vmem:[#allocation5 + $0xd8] sm:$0xff]  ;;  %v3828_v27 = vpack.c.bf16 %v1111_v26, %v1109_v25  ;;  %v1323_v28 = vld [vmem:[#allocation5 + $0x208] sm:$0xff] }
  0xc2   : > { %v1325_v29 = vld [vmem:[#allocation5 + $0x218] sm:$0xff]  ;;  %v1335_v26 = vld [vmem:[#allocation5 + $0x268] sm:$0xff] }
  0xc3   : > { %v534_v35 = vpop.permute.xlu1 %533  ;;  %3121 = vmatpush1.bf16.msra.mxu0 %v3120_v30  ;;  %v3162_v30 = vpack.c.bf16 %v1325_v29, %v1323_v28  ;;  %v1337_v28 = vld [vmem:[#allocation5 + $0x278] sm:$0xff] }
  0xc4   : > { %v532_v36 = vpop.permute.xlu0 %531  ;;  %v594_v37 = vsel %vm588_vm1, %v577_v33, %v534_v35  ;;  %v1082_v33 = vld [vmem:[#allocation5 + $0x108] sm:$0xff]  ;;  %v884_v35 = vld [vmem:[#allocation5 + $0xc0] sm:$0xff] }
  0xc5   : > { %v593_v38 = vsel %vm588_vm1, %v576_v34, %v532_v36  ;;  %v3122_v34 = vpack.c.bf16 %v887_v32, %v885_v31  ;;  %v886_v36 = vld [vmem:[#allocation5 + $0xd0] sm:$0xff]  ;;  %v3835_v31 = vld [vmem:[%s4343_s2] ss:$0 sm:$0xff] }
  0xc6   : > { %2969 = vmatprep.mubr.msk.f32.mxu1 %vm618_vm2, %v593_v38  ;;  %v3124_v38 = vpack.c.bf16 %v886_v36, %v884_v35 }
  0xc7   : > { %2970 = vmatmul.mubr.msk.f32.gmra.mrb[4].mxu1 %vm618_vm2, %v594_v37  ;;  %v474_v39 = vpop.permute.xlu1 %473  ;;  %v1084_v37 = vld [vmem:[#allocation5 + $0x118] sm:$0xff]  ;;  %3123 = vmatprep.subr.bf16.mxu0 %v3122_v34 }
  0xc8   : > { %v472_v40 = vpop.permute.xlu0 %471  ;;  %v579_v43 = vsel %vm571_vm0, %v402_v41, %v474_v39  ;;  %v3130_v39 = vpack.c.bf16 %v1084_v37, %v1082_v33  ;;  %v1083_v41 = vld [vmem:[#allocation5 + $0x110] sm:$0xff]  ;;  %3125 = vmatpush1.bf16.msra.mxu0 %v3124_v38 }
  0xc9   : > { %v578_v44 = vsel %vm571_vm0, %v401_v42, %v472_v40  ;;  %v1081_v40 = vld [vmem:[#allocation5 + $0x100] sm:$0xff] }
  0xca   : > { %v3785_v42 = vpack.c.bf16 %v1083_v41, %v1081_v40  ;;  %3280 = vmatprep.subr.bf16.mxu1 %v3130_v39 }
  0xcb   : > { %v538_v45 = vpop.permute.xlu1 %537 }
  0xcc   : > { %v536_v46 = vpop.permute.xlu0 %535  ;;  %v596_v47 = vsel %vm588_vm1, %v579_v43, %v538_v45  ;;  %v889_v43 = vld [vmem:[#allocation5 + $0xe8] sm:$0xff]  ;;  %3288 = vmatpush1.bf16.msra.mxu1 %v3785_v42 }
  0xcd   : > { %v595_v48 = vsel %vm588_vm1, %v578_v44, %v536_v46  ;;  %v891_v44 = vld [vmem:[#allocation5 + $0xf8] sm:$0xff]  ;;  %v1086_v45 = vld [vmem:[#allocation5 + $0x128] sm:$0xff] }
  0xce   : > { %2972 = vmatprep.mubr.msk.f32.mxu1 %vm618_vm2, %v595_v48  ;;  %v3126_v46 = vpack.c.bf16 %v891_v44, %v889_v43  ;;  %v890_v48 = vld [vmem:[#allocation5 + $0xf0] sm:$0xff] }
  0xcf   : > { %2973 = vmatmul.mubr.msk.f32.gmra.mrb[6].mxu1 %vm618_vm2, %v596_v47  ;;  %v478_v49 = vpop.permute.xlu1 %477  ;;  %v888_v47 = vld [vmem:[#allocation5 + $0xe0] sm:$0xff] }
  0xd0   : > { %v476_v50 = vpop.permute.xlu0 %475  ;;  %v581_v53 = vsel %vm571_vm0, %v404_v51, %v478_v49  ;;  %v1088_v49 = vld [vmem:[#allocation5 + $0x138] sm:$0xff]  ;;  %3127 = vmatprep.subr.bf16.mxu0 %v3126_v46 }
  0xd1   : > { %v580_v54 = vsel %vm571_vm0, %v403_v52, %v476_v50  ;;  %v3128_v50 = vpack.c.bf16 %v890_v48, %v888_v47  ;;  %v3788_v51 = vpack.c.bf16 %v1088_v49, %v1086_v45  ;;  %v1085_v52 = vld [vmem:[#allocation5 + $0x120] sm:$0xff] }
  0xd3   : > { %v542_v55 = vpop.permute.xlu1 %541  ;;  %3129 = vmatpush1.bf16.msra.mxu0 %v3128_v50  ;;  %3281 = vmatprep.subr.bf16.mxu1 %v3788_v51 }
  0xd4   : > { %v540_v56 = vpop.permute.xlu0 %539  ;;  %v598_v57 = vsel %vm588_vm1, %v581_v53, %v542_v55  ;;  %v1087_v53 = vld [vmem:[#allocation5 + $0x130] sm:$0xff]  ;;  %v1090_v55 = vld [vmem:[#allocation5 + $0x148] sm:$0xff]  ;;  %3131 = vmatprep.subr.bf16.mxu0 %v3130_v39 }
  0xd5   : > { %v597_v58 = vsel %vm588_vm1, %v580_v54, %v540_v56  ;;  %v3790_v54 = vpack.c.bf16 %v1087_v53, %v1085_v52  ;;  %v1092_v56 = vld [vmem:[#allocation5 + $0x158] sm:$0xff] }
  0xd6   : > { %2975 = vmatprep.mubr.msk.f32.mxu1 %vm618_vm2, %v597_v58  ;;  %v1089_v58 = vld [vmem:[#allocation5 + $0x140] sm:$0xff] }
  0xd7   : > { %2976 = vmatmul.mubr.msk.f32.gmra.mrb[8].mxu1 %vm618_vm2, %v598_v57  ;;  %v482_v59 = vpop.permute.xlu1 %481  ;;  %v3794_v57 = vpack.c.bf16 %v1092_v56, %v1090_v55 }
  0xd8   : > { %v480_v60 = vpop.permute.xlu0 %479  ;;  %v583_v63 = vsel %vm571_vm0, %v406_v61, %v482_v59  ;;  %3289 = vmatpush1.bf16.msra.mxu1 %v3790_v54  ;;  %v1091_v59 = vld [vmem:[#allocation5 + $0x150] sm:$0xff] }
  0xd9   : > { %v582_v0 = vsel %vm571_vm0, %v405_v62, %v480_v60  ;;  %v3517_v60 = vmov 0.0   ;;  %v3797_v61 = vpack.c.bf16 %v1091_v59, %v1089_v58  ;;  %3282 = vmatprep.subr.bf16.mxu1 %v3794_v57  ;;  %v1094_v62 = vld [vmem:[#allocation5 + $0x168] sm:$0xff] }
  0xda   : > { %968 = vmatprep.mubr.f32.mxu0 %v3517_v60 }
  0xdb   : > { %v546_v1 = vpop.permute.xlu1 %545 }
  0xdc   : > { %v544_v2 = vpop.permute.xlu0 %543  ;;  %v600_v3 = vsel %vm588_vm1, %v583_v63, %v546_v1  ;;  %v1096_v63 = vld [vmem:[#allocation5 + $0x178] sm:$0xff]  ;;  %3290 = vmatpush1.bf16.msra.mxu1 %v3797_v61  ;;  %v1093_v1 = vld [vmem:[#allocation5 + $0x160] sm:$0xff] }
  0xdd   : > { %v599_v4 = vsel %vm588_vm1, %v582_v0, %v544_v2  ;;  %v3802_v0 = vpack.c.bf16 %v1096_v63, %v1094_v62  ;;  %v1095_v2 = vld [vmem:[#allocation5 + $0x170] sm:$0xff]  ;;  %v1322_v63 = vld [vmem:[#allocation5 + $0x200] sm:$0xff] }
  0xde   : > { %2978 = vmatprep.mubr.msk.f32.mxu1 %vm618_vm2, %v599_v4  ;;  %v1098_v4 = vld [vmem:[#allocation5 + $0x188] sm:$0xff] }
  0xdf   : > { %2979 = vmatmul.mubr.msk.f32.gmra.mrb[10].mxu1 %vm618_vm2, %v600_v3  ;;  %v486_v5 = vpop.permute.xlu1 %485  ;;  %v3804_v3 = vpack.c.bf16 %v1095_v2, %v1093_v1  ;;  %3283 = vmatprep.subr.bf16.mxu1 %v3802_v0 }
  0xe0   : > { %v484_v6 = vpop.permute.xlu0 %483  ;;  %v585_v9 = vsel %vm571_vm0, %v408_v7, %v486_v5  ;;  %v1100_v5 = vld [vmem:[#allocation5 + $0x198] sm:$0xff]  ;;  %v1097_v7 = vld [vmem:[#allocation5 + $0x180] sm:$0xff] }
  0xe1   : > { %v584_v10 = vsel %vm571_vm0, %v407_v8, %v484_v6  ;;  %3291 = vmatpush1.bf16.msra.mxu1 %v3804_v3  ;;  %v3808_v6 = vpack.c.bf16 %v1100_v5, %v1098_v4  ;;  %v1099_v8 = vld [vmem:[#allocation5 + $0x190] sm:$0xff]  ;;  %v1327_v4 = vld [vmem:[#allocation5 + $0x228] sm:$0xff]  ;;  %v1329_v5 = vld [vmem:[#allocation5 + $0x238] sm:$0xff] }
  0xe3   : > { %v550_v11 = vpop.permute.xlu1 %549  ;;  %3284 = vmatprep.subr.bf16.mxu1 %v3808_v6 }
  0xe4   : > { %v548_v12 = vpop.permute.xlu0 %547  ;;  %v602_v13 = vsel %vm588_vm1, %v585_v9, %v550_v11  ;;  %v3810_v9 = vpack.c.bf16 %v1099_v8, %v1097_v7  ;;  %v1104_v11 = vld [vmem:[#allocation5 + $0x1b8] sm:$0xff] }
  0xe5   : > { %v601_v14 = vsel %vm588_vm1, %v584_v10, %v548_v12  ;;  %v1102_v10 = vld [vmem:[#allocation5 + $0x1a8] sm:$0xff] }
  0xe6   : > { %2981 = vmatprep.mubr.msk.f32.mxu1 %vm618_vm2, %v601_v14  ;;  %3292 = vmatpush1.bf16.msra.mxu1 %v3810_v9  ;;  %v3814_v12 = vpack.c.bf16 %v1104_v11, %v1102_v10  ;;  %v1103_v14 = vld [vmem:[#allocation5 + $0x1b0] sm:$0xff]  ;;  %v3166_v10 = vpack.c.bf16 %v1329_v5, %v1327_v4  ;;  %v1326_v11 = vld [vmem:[#allocation5 + $0x220] sm:$0xff] }
  0xe7   : > { %2982 = vmatmul.mubr.msk.f32.gmra.mrb[12].mxu1 %vm618_vm2, %v602_v13  ;;  %v490_v15 = vpop.permute.xlu1 %489  ;;  %v1101_v13 = vld [vmem:[#allocation5 + $0x1a0] sm:$0xff] }
  0xe8   : > { %v488_v16 = vpop.permute.xlu0 %487  ;;  %v587_v19 = vsel %vm571_vm0, %v410_v17, %v490_v15  ;;  %v3816_v15 = vpack.c.bf16 %v1103_v14, %v1101_v13  ;;  %3285 = vmatprep.subr.bf16.mxu1 %v3814_v12  ;;  %v1108_v17 = vld [vmem:[#allocation5 + $0x1d8] sm:$0xff]  ;;  %v1328_v13 = vld [vmem:[#allocation5 + $0x230] sm:$0xff]  ;;  %v1331_v14 = vld [vmem:[#allocation5 + $0x248] sm:$0xff] }
  0xe9   : > { %v586_v20 = vsel %vm571_vm0, %v409_v18, %v488_v16  ;;  %v1106_v16 = vld [vmem:[#allocation5 + $0x1c8] sm:$0xff] }
  0xea   : > { %3293 = vmatpush1.bf16.msra.mxu1 %v3816_v15  ;;  %v3820_v18 = vpack.c.bf16 %v1108_v17, %v1106_v16  ;;  %v1333_v16 = vld [vmem:[#allocation5 + $0x258] sm:$0xff]  ;;  %v3168_v17 = vpack.c.bf16 %v1328_v13, %v1326_v11 }
  0xeb   : > { %v554_v21 = vpop.permute.xlu1 %553 }
  0xec   : > { %v552_v22 = vpop.permute.xlu0 %551  ;;  %v604_v23 = vsel %vm588_vm1, %v587_v19, %v554_v21  ;;  %v1105_v19 = vld [vmem:[#allocation5 + $0x1c0] sm:$0xff]  ;;  %3286 = vmatprep.subr.bf16.mxu1 %v3820_v18 }
  0xed   : > { %v603_v24 = vsel %vm588_vm1, %v586_v20, %v552_v22  ;;  %v1107_v20 = vld [vmem:[#allocation5 + $0x1d0] sm:$0xff]  ;;  %v1110_v22 = vld [vmem:[#allocation5 + $0x1e8] sm:$0xff] }
  0xee   : > { %2984 = vmatprep.mubr.msk.f32.mxu1 %vm618_vm2, %v603_v24  ;;  %v3822_v21 = vpack.c.bf16 %v1107_v20, %v1105_v19  ;;  %v1330_v20 = vld [vmem:[#allocation5 + $0x240] sm:$0xff] }
  0xef   : > { %2985 = vmatmul.mubr.msk.f32.gmra.mrb[14].mxu1 %vm618_vm2, %v604_v23  ;;  %v1112_v23 = vld [vmem:[#allocation5 + $0x1f8] sm:$0xff] }
  0xf0   : > { %1225 = vmatprep.mubr.f32.mxu1 %v3517_v60  ;;  %3294 = vmatpush1.bf16.msra.mxu1 %v3822_v21  ;;  %v3826_v24 = vpack.c.bf16 %v1112_v23, %v1110_v22  ;;  %v1332_v22 = vld [vmem:[#allocation5 + $0x250] sm:$0xff] }
  0xf2   : > { %3287 = vmatprep.subr.bf16.mxu1 %v3826_v24 }
  0xf4   : > { %3295 = vmatpush1.bf16.msra.mxu1 %v3828_v27 }
  0xf5   : > { %3163 = vmatprep.subr.bf16.mxu1 %v3162_v30 }
 0x18a   : > { %v2965_v32 = vpop.f32.mrb[0].mxu1 }
 0x18b   : > { %v3838_v33 = vadd.f32 %v2965_v32, %v3835_v31  ;;  %v733_v34 = vpop.f32.mrb[1].mxu1  ;;  %v3172_v32 = vpack.c.bf16 %v1332_v22, %v1330_v20  ;;  %v1353_v20 = vld [vmem:[#allocation5 + $0x2f8] sm:$0xff] }
 0x18c   : > { %v3841_v35 = vadd.f32 %v3835_v31, %v733_v34 }
 0x18d   : > { %v813_v36 = vmax.f32 %v3838_v33, 0.0 }
 0x18e   : > { %v812_v37 = vmax.f32 %v3841_v35, 0.0 }
 0x18f   : > { %829 = vst [vmem:[#allocation2 + $0x9] sm:$0xff] %v813_v36 }
 0x190   : > { %828 = vst [vmem:[#allocation2 + $0x1] sm:$0xff] %v812_v37 }
 0x192   : > { %v2968_v38 = vpop.f32.mrb[2].mxu1 }
 0x193   : > { %v3850_v39 = vadd.f32 %v2968_v38, %v3835_v31  ;;  %v743_v40 = vpop.f32.mrb[3].mxu1  ;;  %v3174_v38 = vpack.c.bf16 %v1337_v28, %v1335_v26  ;;  %v1350_v28 = vld [vmem:[#allocation5 + $0x2e0] sm:$0xff] }
 0x194   : > { %v3853_v41 = vadd.f32 %v3835_v31, %v743_v40  ;;  %v1334_v40 = vld [vmem:[#allocation5 + $0x260] sm:$0xff] }
 0x195   : > { %v815_v43 = vmax.f32 %v3850_v39, 0.0 }
 0x196   : > { %v814_v44 = vmax.f32 %v3853_v41, 0.0 }
 0x197   : > { %831 = vst [vmem:[#allocation2 + $0x21] sm:$0xff] %v815_v43  ;;  %v844_v45 = vld [vmem:[#allocation2] sm:$0xff]  ;;  %v845_v49 = vld [vmem:[#allocation2 + $0x8] sm:$0xff] }
 0x198   : > { %830 = vst [vmem:[#allocation2 + $0x19] sm:$0xff] %v814_v44  ;;  %969 = vmatmul.mubr.f32.vlgmr.msra.gmra.mrb[0].mxu0 %v844_v45  ;;  %v1336_v45 = vld [vmem:[#allocation5 + $0x270] sm:$0xff] }
 0x199   : > { %974 = vmatprep.mubr.f32.mxu0 %v3517_v60  ;;  %3133 = vmatpush1.bf16.msra.mxu0 %v3785_v42 }
 0x19a   : > { %v2971_v46 = vpop.f32.mrb[4].mxu1  ;;  %3135 = vmatprep.subr.bf16.mxu0 %v3788_v51 }
 0x19b   : > { %v3865_v47 = vadd.f32 %v2971_v46, %v3835_v31  ;;  %v753_v48 = vpop.f32.mrb[5].mxu1 }
 0x19c   : > { %v3868_v50 = vadd.f32 %v3835_v31, %v753_v48  ;;  %975 = vmatmul.mubr.f32.gmra.mrb[2].mxu0 %v845_v49  ;;  %v1339_v48 = vld [vmem:[#allocation5 + $0x288] sm:$0xff]  ;;  %v3176_v49 = vpack.c.bf16 %v1336_v45, %v1334_v40  ;;  %v1307_v45 = vld [vmem:[#allocation2 + $0xa] sm:$0xff] }
 0x19d   : > { %v817_v52 = vmax.f32 %v3865_v47, 0.0  ;;  %980 = vmatprep.mubr.f32.mxu0 %v3517_v60  ;;  %3137 = vmatpush1.bf16.msra.mxu0 %v3790_v54 }
 0x19e   : > { %v816_v42 = vmax.f32 %v3868_v50, 0.0  ;;  %3139 = vmatprep.subr.bf16.mxu0 %v3794_v57 }
 0x19f   : > { %833 = vst [vmem:[#allocation2 + $0x39] sm:$0xff] %v817_v52  ;;  %v846_v51 = vld [vmem:[#allocation2 + $0x18] sm:$0xff]  ;;  %v847_v56 = vld [vmem:[#allocation2 + $0x20] sm:$0xff] }
 0x1a0   : > { %832 = vst [vmem:[#allocation2 + $0x31] sm:$0xff] %v816_v42  ;;  %981 = vmatmul.mubr.f32.gmra.mrb[4].mxu0 %v846_v51 }
 0x1a1   : > { %986 = vmatprep.mubr.f32.mxu0 %v3517_v60  ;;  %3141 = vmatpush1.bf16.msra.mxu0 %v3797_v61 }
 0x1a2   : > { %v2974_v53 = vpop.f32.mrb[6].mxu1  ;;  %3143 = vmatprep.subr.bf16.mxu0 %v3802_v0  ;;  %v1324_v0 = vld [vmem:[#allocation5 + $0x210] sm:$0xff] }
 0x1a3   : > { %v3883_v54 = vadd.f32 %v2974_v53, %v3835_v31  ;;  %v763_v55 = vpop.f32.mrb[7].mxu1  ;;  %v3164_v8 = vpack.c.bf16 %v1324_v0, %v1322_v63  ;;  %v1343_v0 = vld [vmem:[#allocation5 + $0x2a8] sm:$0xff] }
 0x1a4   : > { %v3886_v57 = vadd.f32 %v3835_v31, %v763_v55  ;;  %987 = vmatmul.mubr.f32.gmra.mrb[6].mxu0 %v847_v56  ;;  %v1338_v55 = vld [vmem:[#allocation5 + $0x280] sm:$0xff]  ;;  %v1340_v56 = vld [vmem:[#allocation5 + $0x290] sm:$0xff] }
 0x1a5   : > { %v819_v58 = vmax.f32 %v3883_v54, 0.0  ;;  %992 = vmatprep.mubr.f32.mxu0 %v3517_v60  ;;  %3145 = vmatpush1.bf16.msra.mxu0 %v3804_v3  ;;  %v1708_v54 = vld [vmem:[%s4346_s5 + $0x88] sm:$0xff] }
 0x1a6   : > { %v818_v59 = vmax.f32 %v3886_v57, 0.0  ;;  %3147 = vmatprep.subr.bf16.mxu0 %v3808_v6  ;;  %v1311_v35 = vld [vmem:[#allocation2 + $0x3a] sm:$0xff] }
 0x1a7   : > { %835 = vst [vmem:[#allocation2 + $0x51] sm:$0xff] %v819_v58  ;;  %v848_v61 = vld [vmem:[#allocation2 + $0x30] sm:$0xff]  ;;  %v849_v3 = vld [vmem:[#allocation2 + $0x38] sm:$0xff] }
 0x1a8   : > { %834 = vst [vmem:[#allocation2 + $0x49] sm:$0xff] %v818_v59  ;;  %993 = vmatmul.mubr.f32.gmra.mrb[8].mxu0 %v848_v61 }
 0x1a9   : > { %998 = vmatprep.mubr.f32.mxu0 %v3517_v60  ;;  %3149 = vmatpush1.bf16.msra.mxu0 %v3810_v9 }
 0x1aa   : > { %v2977_v62 = vpop.f32.mrb[8].mxu1  ;;  %3151 = vmatprep.subr.bf16.mxu0 %v3814_v12 }
 0x1ab   : > { %v779_v1 = vadd.f32 %v2977_v62, %v3835_v31  ;;  %v773_v2 = vpop.f32.mrb[9].mxu1 }
 0x1ac   : > { %v774_v6 = vadd.f32 %v3835_v31, %v773_v2  ;;  %999 = vmatmul.mubr.f32.gmra.mrb[10].mxu0 %v849_v3  ;;  %v3180_v3 = vpack.c.bf16 %v1340_v56, %v1338_v55  ;;  %v1693_v55 = vld [vmem:[%s4346_s5 + $0x10] sm:$0xff]  ;;  %v1694_v56 = vld [vmem:[%s4346_s5 + $0x18] sm:$0xff] }
 0x1ad   : > { %v821_v7 = vmax.f32 %v779_v1, 0.0  ;;  %1004 = vmatprep.mubr.f32.mxu0 %v3517_v60  ;;  %3153 = vmatpush1.bf16.msra.mxu0 %v3816_v15  ;;  %v3170_v15 = vpack.c.bf16 %v1333_v16, %v1331_v14  ;;  %v1348_v14 = vld [vmem:[#allocation5 + $0x2d0] sm:$0xff] }
 0x1ae   : > { %v820_v9 = vmax.f32 %v774_v6, 0.0  ;;  %3155 = vmatprep.subr.bf16.mxu0 %v3820_v18  ;;  %v1342_v6 = vld [vmem:[#allocation5 + $0x2a0] sm:$0xff] }
 0x1af   : > { %837 = vst [vmem:[#allocation2 + $0x69] sm:$0xff] %v821_v7  ;;  %v850_v12 = vld [vmem:[#allocation2 + $0x48] sm:$0xff]  ;;  %v851_v25 = vld [vmem:[#allocation2 + $0x50] sm:$0xff] }
 0x1b0   : > { %836 = vst [vmem:[#allocation2 + $0x61] sm:$0xff] %v820_v9  ;;  %1005 = vmatmul.mubr.f32.gmra.mrb[12].mxu0 %v850_v12  ;;  %1226 = vmatmul.mubr.f32.vlgmr.msra.gmra.mrb[16].mxu1 %v820_v9  ;;  %v1347_v9 = vld [vmem:[#allocation5 + $0x2c8] sm:$0xff]  ;;  %v1346_v12 = vld [vmem:[#allocation5 + $0x2c0] sm:$0xff] }
 0x1b1   : > { %1010 = vmatprep.mubr.f32.mxu0 %v3517_v60  ;;  %3165 = vmatpush1.bf16.msra.mxu1 %v3164_v8  ;;  %v1312_v33 = vld [vmem:[#allocation2 + $0x4a] sm:$0xff] }
 0x1b2   : > { %v2980_v19 = vpop.f32.mrb[10].mxu1  ;;  %1231 = vmatprep.mubr.f32.mxu1 %v3517_v60  ;;  %3167 = vmatprep.subr.bf16.mxu1 %v3166_v10 }
 0x1b3   : > { %v789_v18 = vadd.f32 %v2980_v19, %v3835_v31  ;;  %v783_v23 = vpop.f32.mrb[11].mxu1  ;;  %3157 = vmatpush1.bf16.msra.mxu0 %v3822_v21  ;;  %v1341_v21 = vld [vmem:[#allocation5 + $0x298] sm:$0xff] }
 0x1b4   : > { %v784_v29 = vadd.f32 %v3835_v31, %v783_v23  ;;  %1011 = vmatmul.mubr.f32.gmra.mrb[14].mxu0 %v851_v25  ;;  %1232 = vmatmul.mubr.f32.gmra.mrb[18].mxu1 %v821_v7  ;;  %v3178_v53 = vpack.c.bf16 %v1341_v21, %v1339_v48  ;;  %v1344_v7 = vld [vmem:[#allocation5 + $0x2b0] sm:$0xff]  ;;  %v3188_v23 = vpack.c.bf16 %v1348_v14, %v1346_v12  ;;  %v1310_v21 = vld [vmem:[#allocation2 + $0x32] sm:$0xff] }
 0x1b5   : > { %v823_v30 = vmax.f32 %v789_v18, 0.0  ;;  %1016 = vmatprep.mubr.f32.mxu0 %v3517_v60  ;;  %3169 = vmatpush1.bf16.msra.mxu1 %v3168_v17  ;;  %v3184_v10 = vpack.c.bf16 %v1344_v7, %v1342_v6  ;;  %v1309_v48 = vld [vmem:[#allocation2 + $0x22] sm:$0xff]  ;;  %v1697_v6 = vld [vmem:[%s4346_s5 + $0x30] sm:$0xff]  ;;  %v1698_v7 = vld [vmem:[%s4346_s5 + $0x38] sm:$0xff] }
 0x1b6   : > { %v822_v34 = vmax.f32 %v784_v29, 0.0  ;;  %1237 = vmatprep.mubr.f32.mxu1 %v3517_v60  ;;  %3171 = vmatprep.subr.bf16.mxu1 %v3170_v15  ;;  %v1351_v15 = vld [vmem:[#allocation5 + $0x2e8] sm:$0xff]  ;;  %v1352_v29 = vld [vmem:[#allocation5 + $0x2f0] sm:$0xff]  ;;  %v1315_v39 = vld [vmem:[#allocation2 + $0x6a] sm:$0xff] }
 0x1b7   : > { %839 = vst [vmem:[#allocation2 + $0x81] sm:$0xff] %v823_v30  ;;  %v852_v46 = vld [vmem:[#allocation2 + $0x60] sm:$0xff]  ;;  %3159 = vmatprep.subr.bf16.mxu0 %v3826_v24  ;;  %v853_v63 = vld [vmem:[#allocation2 + $0x68] sm:$0xff]  ;;  %v3190_v26 = vpack.c.bf16 %v1353_v20, %v1351_v15  ;;  %v1717_v14 = vld [vmem:[%s4346_s5 + $0xd0] sm:$0xff] }
 0x1b8   : > { %838 = vst [vmem:[#allocation2 + $0x79] sm:$0xff] %v822_v34  ;;  %1017 = vmatmul.mubr.f32.gmra.mrb[16].mxu0 %v852_v46  ;;  %1238 = vmatmul.mubr.f32.gmra.mrb[20].mxu1 %v822_v34  ;;  %v1345_v24 = vld [vmem:[#allocation5 + $0x2b8] sm:$0xff]  ;;  %v1308_v46 = vld [vmem:[#allocation2 + $0x1a] sm:$0xff] }
 0x1b9   : > { %1022 = vmatprep.mubr.f32.mxu0 %v3517_v60  ;;  %3173 = vmatpush1.bf16.msra.mxu1 %v3172_v32  ;;  %v3182_v5 = vpack.c.bf16 %v1345_v24, %v1343_v0  ;;  %v1695_v24 = vld [vmem:[%s4346_s5 + $0x20] sm:$0xff]  ;;  %v1702_v15 = vld [vmem:[%s4346_s5 + $0x58] sm:$0xff] }
 0x1ba   : > { %v2983_v51 = vpop.f32.mrb[12].mxu1  ;;  %1243 = vmatprep.mubr.f32.mxu1 %v3517_v60  ;;  %3175 = vmatprep.subr.bf16.mxu1 %v3174_v38  ;;  %v1306_v38 = vld [vmem:[#allocation2 + $0x2] sm:$0xff] }
 0x1bb   : > { %v799_v61 = vadd.f32 %v2983_v51, %v3835_v31  ;;  %v793_v62 = vpop.f32.mrb[13].mxu1  ;;  %3161 = vmatpush1.bf16.msra.mxu0 %v3828_v27  ;;  %v1349_v27 = vld [vmem:[#allocation5 + $0x2d8] sm:$0xff]  ;;  %v1710_v51 = vld [vmem:[%s4346_s5 + $0x98] sm:$0xff] }
 0x1bc   : > { %v794_v1 = vadd.f32 %v3835_v31, %v793_v62  ;;  %1023 = vmatmul.mubr.f32.gmra.mrb[18].mxu0 %v853_v63  ;;  %1244 = vmatmul.mubr.f32.gmra.mrb[22].mxu1 %v823_v30  ;;  %v3186_v13 = vpack.c.bf16 %v1349_v27, %v1347_v9  ;;  %v1711_v62 = vld [vmem:[%s4346_s5 + $0xa0] sm:$0xff]  ;;  %v1712_v63 = vld [vmem:[%s4346_s5 + $0xa8] sm:$0xff] }
 0x1bd   : > { %v825_v2 = vmax.f32 %v799_v61, 0.0  ;;  %1028 = vmatprep.mubr.f32.mxu0 %v3517_v60  ;;  %3177 = vmatpush1.bf16.msra.mxu1 %v3176_v49  ;;  %v1709_v49 = vld [vmem:[%s4346_s5 + $0x90] sm:$0xff]  ;;  %v3200_v61 = vpack.c.bf16 %v1694_v56, %v1693_v55  ;;  %v3202_v0 = vpack.c.bf16 %v1712_v63, %v1711_v62  ;;  %v1715_v9 = vld [vmem:[%s4346_s5 + $0xc0] sm:$0xff]  ;;  %v1716_v27 = vld [vmem:[%s4346_s5 + $0xc8] sm:$0xff] }
 0x1be   : > { %v824_v4 = vmax.f32 %v794_v1, 0.0  ;;  %1249 = vmatprep.mubr.f32.mxu1 %v3517_v60  ;;  %3179 = vmatprep.subr.bf16.mxu1 %v3178_v53  ;;  %v3198_v53 = vpack.c.bf16 %v1710_v51, %v1709_v49  ;;  %v1696_v1 = vld [vmem:[%s4346_s5 + $0x28] sm:$0xff] }
 0x1bf   : > { %841 = vst [vmem:[#allocation2 + $0x99] sm:$0xff] %v825_v2  ;;  %v854_v8 = vld [vmem:[#allocation2 + $0x78] sm:$0xff]  ;;  %v855_v19 = vld [vmem:[#allocation2 + $0x80] sm:$0xff] }
 0x1c0   : > { %840 = vst [vmem:[#allocation2 + $0x91] sm:$0xff] %v824_v4  ;;  %1029 = vmatmul.mubr.f32.gmra.mrb[20].mxu0 %v854_v8  ;;  %1250 = vmatmul.mubr.f32.gmra.mrb[24].mxu1 %v824_v4  ;;  %v1316_v41 = vld [vmem:[#allocation2 + $0x7a] sm:$0xff]  ;;  %v3208_v8 = vpack.c.bf16 %v1698_v7, %v1697_v6 }
 0x1c1   : > { %1034 = vmatprep.mubr.f32.mxu0 %v3517_v60  ;;  %3181 = vmatpush1.bf16.msra.mxu1 %v3180_v3  ;;  %v1713_v3 = vld [vmem:[%s4346_s5 + $0xb0] sm:$0xff]  ;;  %v1714_v4 = vld [vmem:[%s4346_s5 + $0xb8] sm:$0xff] }
 0x1c2   : > { %v2986_v11 = vpop.f32.mrb[14].mxu1  ;;  %1255 = vmatprep.mubr.f32.mxu1 %v3517_v60  ;;  %3183 = vmatprep.subr.bf16.mxu1 %v3182_v5  ;;  %v3206_v5 = vpack.c.bf16 %v1714_v4, %v1713_v3 }
 0x1c3   : > { %v809_v16 = vadd.f32 %v2986_v11, %v3835_v31  ;;  %v803_v17 = vpop.f32.mrb[15].mxu1  ;;  %v1699_v11 = vld [vmem:[%s4346_s5 + $0x40] sm:$0xff] }
 0x1c4   : > { %v804_v22 = vadd.f32 %v3835_v31, %v803_v17  ;;  %1035 = vmatmul.mubr.f32.gmra.mrb[22].mxu0 %v855_v19  ;;  %1256 = vmatmul.mubr.f32.gmra.mrb[26].mxu1 %v825_v2  ;;  %v3192_v31 = vpack.c.bf16 %v1352_v29, %v1350_v28  ;;  %v3204_v2 = vpack.c.bf16 %v1696_v1, %v1695_v24  ;;  %v1701_v19 = vld [vmem:[%s4346_s5 + $0x50] sm:$0xff] }
 0x1c5   : > { %v827_v18 = vmax.f32 %v809_v16, 0.0  ;;  %1040 = vmatprep.mubr.f32.mxu0 %v3517_v60  ;;  %3185 = vmatpush1.bf16.msra.mxu1 %v3184_v10  ;;  %v3210_v10 = vpack.c.bf16 %v1716_v27, %v1715_v9  ;;  %v1718_v16 = vld [vmem:[%s4346_s5 + $0xd8] sm:$0xff]  ;;  %v3216_v20 = vpack.c.bf16 %v1702_v15, %v1701_v19  ;;  %v1721_v29 = vld [vmem:[%s4346_s5 + $0xf0] sm:$0xff] }
 0x1c6   : > { %v826_v25 = vmax.f32 %v804_v22, 0.0  ;;  %1261 = vmatprep.mubr.f32.mxu1 %v3517_v60  ;;  %3187 = vmatprep.subr.bf16.mxu1 %v3186_v13  ;;  %v1319_v47 = vld [vmem:[#allocation2 + $0x9a] sm:$0xff]  ;;  %v1700_v13 = vld [vmem:[%s4346_s5 + $0x48] sm:$0xff]  ;;  %v3214_v17 = vpack.c.bf16 %v1718_v16, %v1717_v14 }
 0x1c7   : > { %843 = vst [vmem:[#allocation2 + $0xb1] sm:$0xff] %v827_v18  ;;  %v856_v30 = vld [vmem:[#allocation2 + $0x90] sm:$0xff]  ;;  %v857_v32 = vld [vmem:[#allocation2 + $0x98] sm:$0xff]  ;;  %v3212_v12 = vpack.c.bf16 %v1700_v13, %v1699_v11  ;;  %v1719_v22 = vld [vmem:[%s4346_s5 + $0xe0] sm:$0xff] }
 0x1c8   : > { %842 = vst [vmem:[#allocation2 + $0xa9] sm:$0xff] %v826_v25  ;;  %1041 = vmatmul.mubr.f32.gmra.mrb[24].mxu0 %v856_v30  ;;  %1262 = vmatmul.mubr.f32.gmra.mrb[28].mxu1 %v826_v25  ;;  %v1703_v25 = vld [vmem:[%s4346_s5 + $0x60] sm:$0xff]  ;;  %v1722_v30 = vld [vmem:[%s4346_s5 + $0xf8] sm:$0xff] }
 0x1c9   : > { %1046 = vmatprep.mubr.f32.mxu0 %v3517_v60  ;;  %3189 = vmatpush1.bf16.msra.mxu1 %v3188_v23 }
 0x1ca   : > { %1267 = vmatprep.mubr.f32.mxu1 %v3517_v60  ;;  %3191 = vmatprep.subr.bf16.mxu1 %v3190_v26  ;;  %v1704_v26 = vld [vmem:[%s4346_s5 + $0x68] sm:$0xff] }
 0x1cb   : > { %v3220_v28 = vpack.c.bf16 %v1704_v26, %v1703_v25 }
 0x1cc   : > { %1047 = vmatmul.mubr.f32.gmra.mrb[26].mxu0 %v857_v32  ;;  %1268 = vmatmul.mubr.f32.gmra.mrb[30].mxu1 %v827_v18  ;;  %v1720_v18 = vld [vmem:[%s4346_s5 + $0xe8] sm:$0xff]  ;;  %v3222_v32 = vpack.c.bf16 %v1722_v30, %v1721_v29 }
 0x1cd   : > { %1052 = vmatprep.mubr.f32.mxu0 %v3517_v60  ;;  %3193 = vmatpush1.bf16.msra.mxu1 %v3192_v31  ;;  %v3218_v23 = vpack.c.bf16 %v1720_v18, %v1719_v22  ;;  %v1705_v31 = vld [vmem:[%s4346_s5 + $0x70] sm:$0xff] }
 0x1ce   : > { %1418 = vmatprep.mubr.f32.mxu1 %v3517_v60 }
 0x1cf   : > { %v858_v34 = vld [vmem:[#allocation2 + $0xa8] sm:$0xff]  ;;  %v859_v40 = vld [vmem:[#allocation2 + $0xb0] sm:$0xff] }
 0x1d0   : > { %1053 = vmatmul.mubr.f32.gmra.mrb[28].mxu0 %v858_v34  ;;  %1419 = vmatmul.mubr.f32.vlgmr.msra.gmra.mrb[32].mxu1 %v1306_v38  ;;  %v1320_v50 = vld [vmem:[#allocation2 + $0xaa] sm:$0xff]  ;;  %v1706_v34 = vld [vmem:[%s4346_s5 + $0x78] sm:$0xff] }
 0x1d1   : > { %1058 = vmatprep.mubr.f32.mxu0 %v3517_v60  ;;  %1424 = vmatprep.mubr.f32.mxu1 %v3517_v60  ;;  %v3224_v38 = vpack.c.bf16 %v1706_v34, %v1705_v31 }
 0x1d4   : > { %1059 = vmatmul.mubr.f32.gmra.mrb[30].mxu0 %v859_v40  ;;  %1425 = vmatmul.mubr.f32.gmra.mrb[34].mxu1 %v1307_v45 }
 0x1d5   : > { %1177 = vmatprep.mubr.f32.mxu0 %v3517_v60  ;;  %1430 = vmatprep.mubr.f32.mxu1 %v3517_v60 }
 0x1d8   : > { %1178 = vmatmul.mubr.f32.vlgmr.msra.gmra.mrb[0].mxu0 %v812_v37  ;;  %1431 = vmatmul.mubr.f32.gmra.mrb[36].mxu1 %v1308_v46  ;;  %v1314_v37 = vld [vmem:[#allocation2 + $0x62] sm:$0xff] }
 0x1d9   : > { %1183 = vmatprep.mubr.f32.mxu0 %v3517_v60  ;;  %1436 = vmatprep.mubr.f32.mxu1 %v3517_v60 }
 0x1dc   : > { %1184 = vmatmul.mubr.f32.gmra.mrb[2].mxu0 %v813_v36  ;;  %1437 = vmatmul.mubr.f32.gmra.mrb[38].mxu1 %v1309_v48  ;;  %v1313_v36 = vld [vmem:[#allocation2 + $0x52] sm:$0xff] }
 0x1dd   : > { %1189 = vmatprep.mubr.f32.mxu0 %v3517_v60  ;;  %1442 = vmatprep.mubr.f32.mxu1 %v3517_v60 }
 0x1e0   : > { %1190 = vmatmul.mubr.f32.gmra.mrb[4].mxu0 %v814_v44  ;;  %1443 = vmatmul.mubr.f32.gmra.mrb[40].mxu1 %v1310_v21  ;;  %v1318_v44 = vld [vmem:[#allocation2 + $0x92] sm:$0xff] }
 0x1e1   : > { %1195 = vmatprep.mubr.f32.mxu0 %v3517_v60  ;;  %1448 = vmatprep.mubr.f32.mxu1 %v3517_v60 }
 0x1e4   : > { %1196 = vmatmul.mubr.f32.gmra.mrb[6].mxu0 %v815_v43  ;;  %1449 = vmatmul.mubr.f32.gmra.mrb[42].mxu1 %v1311_v35  ;;  %v1317_v43 = vld [vmem:[#allocation2 + $0x82] sm:$0xff] }
 0x1e5   : > { %1201 = vmatprep.mubr.f32.mxu0 %v3517_v60  ;;  %1454 = vmatprep.mubr.f32.mxu1 %v3517_v60 }
 0x1e8   : > { %1202 = vmatmul.mubr.f32.gmra.mrb[8].mxu0 %v816_v42  ;;  %1455 = vmatmul.mubr.f32.gmra.mrb[44].mxu1 %v1312_v33  ;;  %v1707_v42 = vld [vmem:[%s4346_s5 + $0x80] sm:$0xff] }
 0x1e9   : > { %1207 = vmatprep.mubr.f32.mxu0 %v3517_v60  ;;  %1460 = vmatprep.mubr.f32.mxu1 %v3517_v60  ;;  %v3194_v57 = vpack.c.bf16 %v1708_v54, %v1707_v42 }
 0x1eb   : > { %3195 = vmatprep.subr.bf16.mxu0 %v3194_v57 }
 0x1ec   : > { %1208 = vmatmul.mubr.f32.gmra.mrb[10].mxu0 %v817_v52  ;;  %1461 = vmatmul.mubr.f32.gmra.mrb[46].mxu1 %v1313_v36  ;;  %v1321_v52 = vld [vmem:[#allocation2 + $0xb2] sm:$0xff] }
 0x1ed   : > { %1213 = vmatprep.mubr.f32.mxu0 %v3517_v60  ;;  %1466 = vmatprep.mubr.f32.mxu1 %v3517_v60 }
 0x1f0   : > { %1214 = vmatmul.mubr.f32.gmra.mrb[12].mxu0 %v818_v59  ;;  %1467 = vmatmul.mubr.f32.gmra.mrb[16].mxu1 %v1314_v37  ;;  %v1692_v59 = vld [vmem:[%s4346_s5 + $0x8] sm:$0xff] }
 0x1f1   : > { %1219 = vmatprep.mubr.f32.mxu0 %v3517_v60  ;;  %1472 = vmatprep.mubr.f32.mxu1 %v3517_v60 }
 0x1f4   : > { %1220 = vmatmul.mubr.f32.gmra.mrb[14].mxu0 %v819_v58  ;;  %1473 = vmatmul.mubr.f32.gmra.mrb[18].mxu1 %v1315_v39  ;;  %v1691_v58 = vld [vmem:[%s4346_s5] sm:$0xff] }
 0x1f5   : > { %1478 = vmatprep.mubr.f32.mxu1 %v3517_v60 }
 0x1f8   : > { %1479 = vmatmul.mubr.f32.gmra.mrb[20].mxu1 %v1316_v41  ;;  %v894_v41 = vlaneseq }
 0x1f9   : > { %1484 = vmatprep.mubr.f32.mxu1 %v3517_v60 }
 0x1fc   : > { %1485 = vmatmul.mubr.f32.gmra.mrb[22].mxu1 %v1317_v43 }
 0x1fd   : > { %1490 = vmatprep.mubr.f32.mxu1 %v3517_v60 }
 0x200   : > { %1491 = vmatmul.mubr.f32.gmra.mrb[24].mxu1 %v1318_v44 }
 0x201   : > { %1496 = vmatprep.mubr.f32.mxu1 %v3517_v60 }
 0x204   : > { %1497 = vmatmul.mubr.f32.gmra.mrb[26].mxu1 %v1319_v47  ;;  %v895_v47 = vshrl.u32 %v894_v41, 7 }
 0x205   : > { %1502 = vmatprep.mubr.f32.mxu1 %v3517_v60 }
 0x206   : > { %v896_v57 = vsub.s32 0, %v895_v47 }
 0x208   : > { %1503 = vmatmul.mubr.f32.gmra.mrb[28].mxu1 %v1320_v50 }
 0x209   : > { %1508 = vmatprep.mubr.f32.mxu1 %v3517_v60  ;;  %v3196_v60 = vpack.c.bf16 %v1692_v59, %v1691_v58  ;;  %v892_v58 = vld [vmem:[%s4345_s4] sm:$0x3]  ;;  %v900_v59 = vsub.s32 1, %v895_v47 }
 0x20a   : > { %v4093_v55 = vrot.slane %v892_v58, %v896_v57 }
 0x20b   : > { %3197 = vmatpush3.bf16.msra.mxu0 %v3196_v60  ;;  %v4095_v56 = vrot.slane %v892_v58, %v900_v59 }
 0x20c   : > { %1509 = vmatmul.mubr.f32.gmra.mrb[30].mxu1 %v1321_v52  ;;  %3199 = vmatprep.subr.bf16.mxu0 %v3198_v53 }
 0x20f   : > { %3201 = vmatpush3.bf16.msra.mxu0 %v3200_v61 }
 0x210   : > { %3203 = vmatprep.subr.bf16.mxu0 %v3202_v0 }
 0x213   : > { %3205 = vmatpush3.bf16.msra.mxu0 %v3204_v2 }
 0x214   : > { %3207 = vmatprep.subr.bf16.mxu0 %v3206_v5 }
 0x217   : > { %3209 = vmatpush3.bf16.msra.mxu0 %v3208_v8 }
 0x218   : > { %3211 = vmatprep.subr.bf16.mxu0 %v3210_v10 }
 0x21b   : > { %3213 = vmatpush3.bf16.msra.mxu0 %v3212_v12 }
 0x21c   : > { %3215 = vmatprep.subr.bf16.mxu0 %v3214_v17 }
 0x21f   : > { %3217 = vmatpush3.bf16.msra.mxu0 %v3216_v20 }
 0x220   : > { %3219 = vmatprep.subr.bf16.mxu0 %v3218_v23 }
 0x223   : > { %3221 = vmatpush3.bf16.msra.mxu0 %v3220_v28 }
 0x224   : > { %3223 = vmatprep.subr.bf16.mxu0 %v3222_v32 }
 0x227   : > { %3225 = vmatpush3.bf16.msra.mxu0 %v3224_v38 }
 0x28b   : > { %v1018_v40 = vpop.f32.mrb[16].mxu0 }
 0x28c   : > { %v1020_v45 = vpop.f32.mrb[17].mxu0  ;;  %v4104_v25 = vadd.f32 %v1018_v40, %v4093_v55 }
 0x28d   : > { %v4107_v26 = vadd.f32 %v1020_v45, %v4095_v56 }
 0x28f   : > { %v1024_v46 = vpop.f32.mrb[18].mxu0 }
 0x290   : > { %v1026_v48 = vpop.f32.mrb[19].mxu0  ;;  %v4110_v32 = vadd.f32 %v1024_v46, %v4093_v55 }
 0x291   : > { %v4113_v34 = vadd.f32 %v1026_v48, %v4095_v56 }
 0x293   : > { %v4066_v21 = vpop.f32.mrb[20].mxu0 }
 0x294   : > { %v4068_v35 = vpop.f32.mrb[21].mxu0  ;;  %v4118_v40 = vadd.f32 %v4066_v21, %v4093_v55 }
 0x295   : > { %v4122_v45 = vadd.f32 %v4068_v35, %v4095_v56 }
 0x297   : > { %v4070_v33 = vpop.f32.mrb[22].mxu0 }
 0x298   : > { %v4072_v36 = vpop.f32.mrb[23].mxu0  ;;  %v4127_v48 = vadd.f32 %v4070_v33, %v4093_v55 }
 0x299   : > { %v4131_v57 = vadd.f32 %v4072_v36, %v4095_v56 }
 0x29b   : > { %v4074_v37 = vpop.f32.mrb[24].mxu0 }
 0x29c   : > { %v4076_v39 = vpop.f32.mrb[25].mxu0  ;;  %v4135_v21 = vadd.f32 %v4074_v37, %v4093_v55 }
 0x29d   : > { %v4139_v35 = vadd.f32 %v4076_v39, %v4095_v56 }
 0x29f   : > { %v4078_v43 = vpop.f32.mrb[26].mxu0 }
 0x2a0   : > { %v4080_v44 = vpop.f32.mrb[27].mxu0  ;;  %v4145_v39 = vadd.f32 %v4078_v43, %v4093_v55 }
 0x2a3   : > { %v4082_v50 = vpop.f32.mrb[28].mxu0  ;;  %v1420_v52 = vpop.f32.mrb[32].mxu1 }
 0x2a4   : > { %v4084_v42 = vpop.f32.mrb[29].mxu0  ;;  %v1422_v54 = vpop.f32.mrb[33].mxu1 }
 0x2a7   : > { %v4089_v60 = vpop.f32.mrb[30].mxu0  ;;  %v1426_v49 = vpop.f32.mrb[34].mxu1 }
 0x2a8   : > { %v4091_v51 = vpop.f32.mrb[31].mxu0  ;;  %v1428_v53 = vpop.f32.mrb[35].mxu1 }
 0x2ab   : > { %v1179_v61 = vpop.f32.mrb[0].mxu0  ;;  %v1432_v62 = vpop.f32.mrb[36].mxu1 }
 0x2ac   : > { %v3296_v63 = vadd.f32 %v1179_v61, %v4093_v55  ;;  %v1181_v0 = vpop.f32.mrb[1].mxu0  ;;  %v1434_v24 = vpop.f32.mrb[37].mxu1 }
 0x2ad   : > { %v3298_v1 = vadd.f32 %v1181_v0, %v4095_v56 }
 0x2ae   : > { %v3297_v2 = vadd.f32 %v3296_v63, %v1420_v52 }
 0x2af   : > { %v3299_v3 = vadd.f32 %v3298_v1, %v1422_v54  ;;  %v1185_v4 = vpop.f32.mrb[2].mxu0  ;;  %v1438_v5 = vpop.f32.mrb[38].mxu1 }
 0x2b0   : > { %v3300_v6 = vadd.f32 %v1185_v4, %v4093_v55  ;;  %v1187_v7 = vpop.f32.mrb[3].mxu0  ;;  %v1440_v8 = vpop.f32.mrb[39].mxu1  ;;  %v1547_v12 = vmax.f32 %v3297_v2, 0.0 }
 0x2b1   : > { %v3302_v9 = vadd.f32 %v1187_v7, %v4095_v56  ;;  %v1548_v15 = vmax.f32 %v3299_v3, 0.0 }
 0x2b2   : > { %v3301_v27 = vadd.f32 %v3300_v6, %v1426_v49 }
 0x2b3   : > { %v3303_v10 = vadd.f32 %v3302_v9, %v1428_v53  ;;  %v1191_v11 = vpop.f32.mrb[4].mxu0  ;;  %v1444_v13 = vpop.f32.mrb[40].mxu1 }
 0x2b4   : > { %v1549_v14 = vmax.f32 %v3301_v27, 0.0  ;;  %v3304_v16 = vadd.f32 %v1191_v11, %v4093_v55  ;;  %v1193_v17 = vpop.f32.mrb[5].mxu0  ;;  %v1446_v19 = vpop.f32.mrb[41].mxu1 }
 0x2b5   : > { %v1550_v20 = vmax.f32 %v3303_v10, 0.0  ;;  %v3306_v22 = vadd.f32 %v1193_v17, %v4095_v56 }
 0x2b6   : > { %v1579_v18 = vadd.f32 %v1549_v14, %v1547_v12  ;;  %v3305_v23 = vadd.f32 %v3304_v16, %v1432_v62  ;;  %v4153_v14 = vadd.f32 %v4082_v50, %v4093_v55 }
 0x2b7   : > { %v1586_v28 = vadd.f32 %v1550_v20, %v1548_v15  ;;  %v3307_v29 = vadd.f32 %v3306_v22, %v1434_v24  ;;  %v1197_v30 = vpop.f32.mrb[6].mxu0  ;;  %v1450_v31 = vpop.f32.mrb[42].mxu1 }
 0x2b8   : > { %v1580_v38 = vrot.slane %v1579_v18, 4  ;;  %v3308_v41 = vadd.f32 %v1197_v30, %v4093_v55  ;;  %v1199_v47 = vpop.f32.mrb[7].mxu0  ;;  %v1452_v52 = vpop.f32.mrb[43].mxu1  ;;  %v1551_v63 = vmax.f32 %v3305_v23, 0.0 }
 0x2b9   : > { %v1587_v54 = vrot.slane %v1586_v28, 4  ;;  %v3310_v46 = vadd.f32 %v1199_v47, %v4095_v56  ;;  %v1552_v3 = vmax.f32 %v3307_v29, 0.0 }
 0x2ba   : > { %v1581_v58 = vadd.f32 %v1580_v38, %v1579_v18  ;;  %v3309_v59 = vadd.f32 %v3308_v41, %v1438_v5 }
 0x2bb   : > { %v1588_v49 = vadd.f32 %v1587_v54, %v1586_v28  ;;  %v3311_v53 = vadd.f32 %v3310_v46, %v1440_v8  ;;  %v1203_v61 = vpop.f32.mrb[8].mxu0  ;;  %v1456_v62 = vpop.f32.mrb[44].mxu1  ;;  %v4149_v8 = vadd.f32 %v4080_v44, %v4095_v56 }
 0x2bc   : > { %v1582_v33 = vrot.slane %v1581_v58, 2  ;;  %v1553_v0 = vmax.f32 %v3309_v59, 0.0  ;;  %v3312_v36 = vadd.f32 %v1203_v61, %v4093_v55  ;;  %v1205_v24 = vpop.f32.mrb[9].mxu0  ;;  %v1458_v1 = vpop.f32.mrb[45].mxu1 }
 0x2bd   : > { %v1589_v2 = vrot.slane %v1588_v49, 2  ;;  %v1554_v4 = vmax.f32 %v3311_v53, 0.0  ;;  %v3314_v37 = vadd.f32 %v1205_v24, %v4095_v56 }
 0x2be   : > { %v1583_v5 = vadd.f32 %v1582_v33, %v1581_v58  ;;  %v1593_v6 = vadd.f32 %v1553_v0, %v1551_v63  ;;  %v3313_v7 = vadd.f32 %v3312_v36, %v1444_v13  ;;  %v4158_v13 = vadd.f32 %v4084_v42, %v4095_v56 }
 0x2bf   : > { %v1590_v9 = vadd.f32 %v1589_v2, %v1588_v49  ;;  %v1600_v27 = vadd.f32 %v1554_v4, %v1552_v3  ;;  %v3315_v10 = vadd.f32 %v3314_v37, %v1446_v19  ;;  %v1209_v11 = vpop.f32.mrb[10].mxu0  ;;  %v1462_v12 = vpop.f32.mrb[46].mxu1 }
 0x2c0   : > { %v1584_v16 = vrot.slane %v1583_v5, 1  ;;  %v1594_v17 = vrot.slane %v1593_v6, 4  ;;  %v3316_v43 = vadd.f32 %v1209_v11, %v4093_v55  ;;  %v1211_v15 = vpop.f32.mrb[11].mxu0  ;;  %v1464_v20 = vpop.f32.mrb[47].mxu1  ;;  %v1555_v23 = vmax.f32 %v3313_v7, 0.0 }
 0x2c1   : > { %v1591_v44 = vrot.slane %v1590_v9, 1  ;;  %v1601_v22 = vrot.slane %v1600_v27, 4  ;;  %v3318_v19 = vadd.f32 %v1211_v15, %v4095_v56  ;;  %v1556_v28 = vmax.f32 %v3315_v10, 0.0 }
 0x2c2   : > { %v1595_v18 = vadd.f32 %v1594_v17, %v1593_v6  ;;  %v3317_v50 = vadd.f32 %v3316_v43, %v1450_v31  ;;  %v1585_v29 = vadd.f32 %v1584_v16, %v1583_v5 }
 0x2c3   : > { %v1592_v30 = vadd.f32 %v1591_v44, %v1590_v9  ;;  %v1602_v38 = vadd.f32 %v1601_v22, %v1600_v27  ;;  %v3319_v41 = vadd.f32 %v3318_v19, %v1452_v52  ;;  %v1215_v47 = vpop.f32.mrb[12].mxu0  ;;  %v1468_v54 = vpop.f32.mrb[16].mxu1 }
 0x2c4   : > { %v1596_v46 = vrot.slane %v1595_v18, 2  ;;  %v1557_v58 = vmax.f32 %v3317_v50, 0.0  ;;  %v3320_v42 = vadd.f32 %v1215_v47, %v4093_v55  ;;  %v1217_v59 = vpop.f32.mrb[13].mxu0  ;;  %v3329_v49 = vadd.f32 %v1468_v54, %v4104_v25  ;;  %v1470_v53 = vpop.f32.mrb[17].mxu1 }
 0x2c5   : > { %v1603_v61 = vrot.slane %v1602_v38, 2  ;;  %v1558_v33 = vmax.f32 %v3319_v41, 0.0  ;;  %v3322_v63 = vadd.f32 %v1217_v59, %v4095_v56  ;;  %v3331_v31 = vadd.f32 %v1470_v53, %v4107_v26 }
 0x2c6   : > { %v1597_v0 = vadd.f32 %v1596_v46, %v1595_v18  ;;  %v1607_v36 = vadd.f32 %v1557_v58, %v1555_v23  ;;  %v3321_v24 = vadd.f32 %v3320_v42, %v1456_v62  ;;  %v1563_v52 = vmax.f32 %v3329_v49, 0.0 }
 0x2c7   : > { %v1604_v2 = vadd.f32 %v1603_v61, %v1602_v38  ;;  %v1614_v3 = vadd.f32 %v1558_v33, %v1556_v28  ;;  %v3323_v4 = vadd.f32 %v3322_v63, %v1458_v1  ;;  %v1221_v37 = vpop.f32.mrb[14].mxu0  ;;  %v1564_v5 = vmax.f32 %v3331_v31, 0.0  ;;  %v1474_v6 = vpop.f32.mrb[18].mxu1 }
 0x2c8   : > { %v1598_v7 = vrot.slane %v1597_v0, 1  ;;  %v1608_v9 = vrot.slane %v1607_v36, 4  ;;  %v1559_v25 = vmax.f32 %v3321_v24, 0.0  ;;  %v3324_v27 = vadd.f32 %v1221_v37, %v4093_v55  ;;  %v1223_v10 = vpop.f32.mrb[15].mxu0  ;;  %v1476_v11 = vpop.f32.mrb[19].mxu1 }
 0x2c9   : > { %v1605_v16 = vrot.slane %v1604_v2, 1  ;;  %v1615_v26 = vrot.slane %v1614_v3, 4  ;;  %v1560_v17 = vmax.f32 %v3323_v4, 0.0  ;;  %v3326_v62 = vadd.f32 %v1223_v10, %v4095_v56 }
 0x2ca   : > { %v1599_v43 = vadd.f32 %v1598_v7, %v1597_v0  ;;  %v1609_v15 = vadd.f32 %v1608_v9, %v1607_v36  ;;  %v3325_v44 = vadd.f32 %v3324_v27, %v1462_v12  ;;  %v3333_v1 = vadd.f32 %v1474_v6, %v4110_v32 }
 0x2cb   : > { %v1606_v22 = vadd.f32 %v1605_v16, %v1604_v2  ;;  %v1616_v19 = vadd.f32 %v1615_v26, %v1614_v3  ;;  %v3327_v18 = vadd.f32 %v3326_v62, %v1464_v20  ;;  %v3335_v23 = vadd.f32 %v1476_v11, %v4113_v34  ;;  %v1480_v28 = vpop.f32.mrb[20].mxu1 }
 0x2cc   : > { %v1747_v50 = vsel %vm1746_vm3, %v1599_v43, %v1585_v29  ;;  %v1610_v38 = vrot.slane %v1609_v15, 2  ;;  %v1561_v41 = vmax.f32 %v3325_v44, 0.0  ;;  %v1565_v47 = vmax.f32 %v3333_v1, 0.0  ;;  %v1482_v54 = vpop.f32.mrb[21].mxu1 }
 0x2cd   : > { %v4171_v46 = vsel %vm1746_vm3, %v1606_v22, %v1592_v30  ;;  %v1617_v58 = vrot.slane %v1616_v19, 2  ;;  %v1562_v42 = vmax.f32 %v3327_v18, 0.0  ;;  %v1566_v12 = vmax.f32 %v3335_v23, 0.0 }
 0x2ce   : > { %v1611_v59 = vadd.f32 %v1610_v38, %v1609_v15  ;;  %v1621_v32 = vadd.f32 %v1561_v41, %v1559_v25  ;;  %v1635_v49 = vadd.f32 %v1565_v47, %v1563_v52  ;;  %v3337_v20 = vadd.f32 %v1480_v28, %v4118_v40 }
 0x2cf   : > { %v1618_v53 = vadd.f32 %v1617_v58, %v1616_v19  ;;  %v1628_v34 = vadd.f32 %v1562_v42, %v1560_v17  ;;  %v1642_v61 = vadd.f32 %v1566_v12, %v1564_v5  ;;  %v3339_v29 = vadd.f32 %v1482_v54, %v4122_v45  ;;  %v1486_v33 = vpop.f32.mrb[22].mxu1 }
 0x2d0   : > { %v4177_v63 = vadd.f32 %v4089_v60, %v4093_v55  ;;  %v1612_v30 = vrot.slane %v1611_v59, 1  ;;  %v1622_v31 = vrot.slane %v1621_v32, 4  ;;  %v1636_v0 = vrot.slane %v1635_v49, 4  ;;  %v1488_v36 = vpop.f32.mrb[23].mxu1 }
 0x2d1   : > { %v1619_v24 = vrot.slane %v1618_v53, 1  ;;  %v1629_v2 = vrot.slane %v1628_v34, 4  ;;  %v1643_v3 = vrot.slane %v1642_v61, 4  ;;  %v1567_v52 = vmax.f32 %v3337_v20, 0.0 }
 0x2d2   : > { %v1613_v4 = vadd.f32 %v1612_v30, %v1611_v59  ;;  %v1623_v40 = vadd.f32 %v1622_v31, %v1621_v32  ;;  %v1637_v37 = vadd.f32 %v1636_v0, %v1635_v49  ;;  %v3341_v5 = vadd.f32 %v1486_v33, %v4127_v48 }
 0x2d3   : > { %v1630_v45 = vadd.f32 %v1629_v2, %v1628_v34  ;;  %v1644_v6 = vadd.f32 %v1643_v3, %v1642_v61  ;;  %v1568_v7 = vmax.f32 %v3339_v29, 0.0  ;;  %v3343_v60 = vadd.f32 %v1488_v36, %v4131_v57  ;;  %v1492_v55 = vpop.f32.mrb[24].mxu1 }
 0x2d4   : > { %v1749_v9 = vsel %vm1748_vm4, %v1613_v4, %v1747_v50  ;;  %v1624_v25 = vrot.slane %v1623_v40, 2  ;;  %v1638_v27 = vrot.slane %v1637_v37, 2  ;;  %v1569_v10 = vmax.f32 %v3341_v5, 0.0  ;;  %v1494_v11 = vpop.f32.mrb[25].mxu1 }
 0x2d5   : > { %v1631_v16 = vrot.slane %v1630_v45, 2  ;;  %v1645_v26 = vrot.slane %v1644_v6, 2  ;;  %v1570_v17 = vmax.f32 %v3343_v60, 0.0  ;;  %v3345_v62 = vadd.f32 %v1492_v55, %v4135_v21 }
 0x2d6   : > { %v1625_v48 = vadd.f32 %v1624_v25, %v1623_v40  ;;  %v1639_v43 = vadd.f32 %v1638_v27, %v1637_v37  ;;  %v1649_v15 = vadd.f32 %v1569_v10, %v1567_v52  ;;  %v3347_v44 = vadd.f32 %v1494_v11, %v4139_v35 }
 0x2d7   : > { %v1620_v1 = vadd.f32 %v1619_v24, %v1618_v53  ;;  %v1632_v57 = vadd.f32 %v1631_v16, %v1630_v45  ;;  %v1646_v22 = vadd.f32 %v1645_v26, %v1644_v6  ;;  %v1656_v19 = vadd.f32 %v1570_v17, %v1568_v7  ;;  %v1498_v18 = vpop.f32.mrb[26].mxu1 }
 0x2d8   : > { %v1626_v23 = vrot.slane %v1625_v48, 1  ;;  %v1640_v28 = vrot.slane %v1639_v43, 1  ;;  %v1650_v50 = vrot.slane %v1649_v15, 4  ;;  %v1571_v38 = vmax.f32 %v3345_v62, 0.0  ;;  %v1500_v41 = vpop.f32.mrb[27].mxu1 }
 0x2d9   : > { %v1633_v47 = vrot.slane %v1632_v57, 1  ;;  %v1647_v54 = vrot.slane %v1646_v22, 1  ;;  %v1657_v58 = vrot.slane %v1656_v19, 4  ;;  %v3349_v21 = vadd.f32 %v1498_v18, %v4145_v39 }
 0x2da   : > { %v1627_v42 = vadd.f32 %v1626_v23, %v1625_v48  ;;  %v1651_v12 = vadd.f32 %v1650_v50, %v1649_v15  ;;  %v1572_v59 = vmax.f32 %v3347_v44, 0.0  ;;  %v3351_v35 = vadd.f32 %v1500_v41, %v4149_v8 }
 0x2db   : > { %v1634_v32 = vadd.f32 %v1633_v47, %v1632_v57  ;;  %v1648_v49 = vadd.f32 %v1647_v54, %v1646_v22  ;;  %v1658_v20 = vadd.f32 %v1657_v58, %v1656_v19  ;;  %v1573_v53 = vmax.f32 %v3349_v21, 0.0  ;;  %v1504_v34 = vpop.f32.mrb[28].mxu1 }
 0x2dc   : > { %v1652_v61 = vrot.slane %v1651_v12, 2  ;;  %v1574_v29 = vmax.f32 %v3351_v35, 0.0  ;;  %v3353_v33 = vadd.f32 %v1504_v34, %v4153_v14  ;;  %v1506_v30 = vpop.f32.mrb[29].mxu1  ;;  %v1761_v31 = vsel %vm1748_vm4, %v1620_v1, %v4171_v46 }
 0x2dd   : > { %v1659_v0 = vrot.slane %v1658_v20, 2  ;;  %v1663_v39 = vadd.f32 %v1573_v53, %v1571_v38  ;;  %v3355_v36 = vadd.f32 %v1506_v30, %v4158_v13  ;;  %v1762_v24 = vsel %vm1750_vm5, %v1634_v32, %v1761_v31  ;;  %v2835_v53 = vld [vmem:[%s4347_s6] ss:$0 sm:$0xff]  ;;  %v1847_v30 = vld [vmem:[%s4348_s7 + $0x8] sm:$0xff] (!%p2837_p4)  ;;  %v1848_v31 = vld [vmem:[%s4348_s7 + $0x10] sm:$0xff] (!%p2837_p4) }
 0x2de   : > { %v1641_v8 = vadd.f32 %v1640_v28, %v1639_v43  ;;  %v1653_v2 = vadd.f32 %v1652_v61, %v1651_v12  ;;  %v1670_v3 = vadd.f32 %v1574_v29, %v1572_v59  ;;  %v1763_v52 = vsel %vm1752_vm6, %v1648_v49, %v1762_v24 }
 0x2df   : > { %v1063_v4 = vadd.f32 %v4091_v51, %v4095_v56  ;;  %v1660_v40 = vadd.f32 %v1659_v0, %v1658_v20  ;;  %v1664_v14 = vrot.slane %v1663_v39, 4  ;;  %v1510_v37 = vpop.f32.mrb[30].mxu1  ;;  %v1751_v5 = vsel %vm1750_vm5, %v1627_v42, %v1749_v9 }
 0x2e0   : > { %v1654_v46 = vrot.slane %v1653_v2, 1  ;;  %v1671_v45 = vrot.slane %v1670_v3, 4  ;;  %v3357_v6 = vadd.f32 %v1510_v37, %v4177_v63  ;;  %v1512_v13 = vpop.f32.mrb[31].mxu1  ;;  %v1753_v7 = vsel %vm1752_vm6, %v1641_v8, %v1751_v5 }
 0x2e1   : > { %v1661_v60 = vrot.slane %v1660_v40, 1  ;;  %v1665_v55 = vadd.f32 %v1664_v14, %v1663_v39  ;;  %v3359_v25 = vadd.f32 %v1512_v13, %v1063_v4  ;;  %v1575_v11 = vmax.f32 %v3353_v33, 0.0  ;;  %v1846_v33 = vld [vmem:[%s4348_s7] sm:$0xff] (!%p2837_p4) }
 0x2e2   : > { %v1655_v27 = vadd.f32 %v1654_v46, %v1653_v2  ;;  %v1672_v10 = vadd.f32 %v1671_v45, %v1670_v3  ;;  %v1577_v51 = vmax.f32 %v3357_v6, 0.0  ;;  %v1576_v26 = vmax.f32 %v3355_v36, 0.0  ;;  %v1849_v36 = vld [vmem:[%s4348_s7 + $0x18] sm:$0xff] (!%p2837_p4) }
 0x2e3   : > { %v1662_v56 = vadd.f32 %v1661_v60, %v1660_v40  ;;  %v1666_v16 = vrot.slane %v1665_v55, 2  ;;  %v1578_v17 = vmax.f32 %v3359_v25, 0.0  ;;  %v3518_v0 = vmov (!%p2837_p4), 0.0|0.0  }
 0x2e4   : > { %v1673_v9 = vrot.slane %v1672_v10, 2  ;;  %v1677_v62 = vadd.f32 %v1577_v51, %v1575_v11  ;;  %v1755_v48 = vsel %vm1754_vm7, %v1655_v27, %v1753_v7  ;;  %3226 = vmatprep.subr.bf16.mxu0 (!%p2837_p4), %v3518_v0  ;;  %v4212_v39 = vpack.c.bf16 (!%p2837_p4), %v1847_v30, %v1846_v33  ;;  %3232 = vmatprep.subr.bf16.mxu1 (!%p2837_p4), %v3518_v0 }
 0x2e5   : > { %v1667_v43 = vadd.f32 %v1666_v16, %v1665_v55  ;;  %v1684_v63 = vadd.f32 %v1578_v17, %v1576_v26  ;;  %v1764_v15 = vsel %vm1754_vm7, %v1662_v56, %v1763_v52  ;;  %v3520_v24 = vmov (!%p2837_p4), 0.0  }
 0x2e6   : > { %v1674_v44 = vadd.f32 %v1673_v9, %v1672_v10  ;;  %v1678_v1 = vrot.slane %v1677_v62, 4  ;;  %3006 = vmatprep.mubr.msk.f32.mxu1 (!%p2837_p4), %vm3519_vm10, %v3520_v24  ;;  %v4223_v8 = vpack.c.bf16 (!%p2837_p4), %v1849_v36, %v1848_v31  ;;  %3234 = vmatpush3.bf16.msra.mxu1 (!%p2837_p4), %v4212_v39 }
 0x2e7   : > { %v1668_v57 = vrot.slane %v1667_v43, 1  ;;  %v1685_v22 = vrot.slane %v1684_v63, 4  ;;  %3235 = vmatprep.subr.bf16.mxu1 (!%p2837_p4), %v3518_v0 }
 0x2e8   : > { %v1675_v19 = vrot.slane %v1674_v44, 1  ;;  %v1679_v18 = vadd.f32 %v1678_v1, %v1677_v62 }
 0x2e9   : > { %v1669_v23 = vadd.f32 %v1668_v57, %v1667_v43  ;;  %v1686_v28 = vadd.f32 %v1685_v22, %v1684_v63 }
 0x2ea   : > { %v1680_v50 = vrot.slane %v1679_v18, 2  ;;  %v1676_v38 = vadd.f32 %v1675_v19, %v1674_v44  ;;  %3237 = vmatpush3.bf16.msra.mxu1 (!%p2837_p4), %v4223_v8 }
 0x2eb   : > { %v1687_v41 = vrot.slane %v1686_v28, 2  ;;  %v1757_v47 = vsel %vm1756_vm8, %v1669_v23, %v1755_v48  ;;  %3244 = vmatprep.subr.bf16.mxu1 (!%p2837_p4), %v3518_v0 }
 0x2ec   : > { %v1681_v54 = vadd.f32 %v1680_v50, %v1679_v18  ;;  %v1765_v58 = vsel %vm1756_vm8, %v1676_v38, %v1764_v15 }
 0x2ed   : > { %v1688_v21 = vadd.f32 %v1687_v41, %v1686_v28 }
 0x2ee   : > { %v1682_v42 = vrot.slane %v1681_v54, 1 }
 0x2ef   : > { %v1689_v12 = vrot.slane %v1688_v21, 1 }
 0x2f0   : > { %v1683_v59 = vadd.f32 %v1682_v42, %v1681_v54 }
 0x2f1   : > { %v1690_v35 = vadd.f32 %v1689_v12, %v1688_v21 }
 0x2f2   : > { %v1759_v32 = vsel %vm1758_vm9, %v1683_v59, %v1757_v47 }
 0x2f3   : > { %v1766_v49 = vsel %vm1758_vm9, %v1690_v35, %v1765_v58 }
 0x2f4   : > { %1833 = vmatprep.mubr.f32.mxu0 %v1766_v49 }
 0x2f5   : > { %1834 = vmatmul.mubr.f32.vlgmr.msra.gmra.mrb[32].mxu0 %v1759_v32 }
 0x2f6   : > { %2995 = vmatprep.mubr.msk.f32.mxu0 (!%p2837_p4), %vm3519_vm10, %v3520_v24  ;;  %3228 = vmatpush3.bf16.msra.mxu0 (!%p2837_p4), %v4212_v39 }
 0x2f7   : > { %3229 = vmatprep.subr.bf16.mxu0 (!%p2837_p4), %v3518_v0 }
 0x2fa   : > { %3231 = vmatpush3.bf16.msra.mxu0 (!%p2837_p4), %v4223_v8 }
 0x2fb   : > { %3238 = vmatprep.subr.bf16.mxu0 (!%p2837_p4), %v3518_v0 }
 0x2fd   : > { %2996 = vmatmul.mubr.f32.vlgmr.msra.gmra.mrb[0].mxu0 (!%p2837_p4), %v3520_v24 }
 0x2fe   : > { %3240 = vmatpush3.bf16.msra.mxu0 (!%p2837_p4), %v4212_v39  ;;  %3017 = vmatprep.mubr.msk.f32.mxu0 (!%p2837_p4), %vm3519_vm10, %v3520_v24 }
 0x2ff   : > { %3241 = vmatprep.subr.bf16.mxu0 (!%p2837_p4), %v3518_v0 }
 0x302   : > { %3243 = vmatpush3.bf16.msra.mxu0 (!%p2837_p4), %v4223_v8 }
 0x303   : > { %3250 = vmatprep.subr.bf16.mxu0 (!%p2837_p4), %v3518_v0 }
 0x3c8   : > { %v2903_v20 = vpop.f32.mrb[32].mxu0  ;;  %1845 = sbr.rel (%p2837_p4) target bundleno = 6625 (0x19e1), region = 72 }
 0x3c9   : > { %v2904_v34 = vpop.f32.mrb[33].mxu0 }
 0x3ca   : > { %v2905_v61 = vadd.f32 %v2904_v34, %v2903_v20 }
 0x3cc   : > { %v1836_v29 = vadd.f32 %v2905_v61, %v2835_v53 }
 0x3ce   : > { %1841 = vst [vmem:[%s1840_s11] sm:$0xff] %v1836_v29 }
 0x3d0   : > { %v1921_v3 = vpop.f32.mrb[0].mxu0 }
 0x3d1   : > { %v2997_v4 = vpop.f32.mrb[1].mxu0 }
 0x3d5   : > { %v4239_v2 = vld [vmem:[#allocation3] sm:$0xff] }
 0x3d6   : > { %v1925_v52 = vadd.f32 %v1921_v3, %v4239_v2 }
 0x3d8   : > { %3423 = vtanh.f32 %v1925_v52  ;;  %v1926_v14 = vmul.f32 0.5, %v1925_v52 }
 0x3da   : > { %3425 = vtanh.f32 %v1926_v14 }
 0x3e2   : > { %v3424_v40 = vpop.eup %3423 }
 0x3e3   : > { %1933 = vrot.lane.b32.xlu0 %v3424_v40, %s3521_s20 }
 0x3e4   : > { %v3426_v37 = vpop.eup %3425 }
 0x3e5   : > { %v1928_v5 = vadd.f32 1.0, %v3426_v37 }
 0x3e7   : > { %v1929_v46 = vmul.f32 0.5, %v1928_v5 }
 0x3e9   : > { %v1931_v13 = vmul.f32 0.0, %v1929_v46 }
 0x455   : > { %v1934_v45 = vpop.permute.xlu0 %1933 }
 0x456   : > { %v1936_v6 = vmul.f32 %v1934_v45, %v1929_v46 }
 0x458   : > { %1938 = vrot.lane.b32.xlu0 %v1936_v6, %s3522_s21 }
 0x4ca   : > { %v1939_v7 = vpop.permute.xlu0 %1938 }
 0x4cb   : > { %v1941_v60 = vadd.f32 %v1939_v7, %v1931_v13 }
 0x4cd   : > { %3427 = vtanh.f32 %v1941_v60  ;;  %v2033_v15 = vrot.slane %v1941_v60, 6 }
 0x4d7   : > { %v3428_v55 = vpop.eup %3427 }
 0x4d8   : > { %1944 = vrot.lane.b32.xlu1 %v3428_v55, %s3521_s20 }
 0x54a   : > { %v1945_v25 = vpop.permute.xlu1 %1944 }
 0x54b   : > { %v1947_v27 = vmul.f32 %v1945_v25, %v1929_v46 }
 0x54d   : > { %1949 = vrot.lane.b32.xlu1 %v1947_v27, %s3522_s21 }
 0x5bf   : > { %v1950_v10 = vpop.permute.xlu1 %1949 }
 0x5c0   : > { %3007 = vmatmul.mubr.msk.f32.vlgmr.msra.gmra.mrb[0].mxu1 %vm588_vm1, %v1950_v10 }
 0x5c1   : > { %3246 = vmatpush3.bf16.msra.mxu1 %v4212_v39  ;;  %3028 = vmatprep.mubr.msk.f32.mxu1 %vm3519_vm10, %v3520_v24 }
 0x5c2   : > { %3247 = vmatprep.subr.bf16.mxu1 %v3518_v0 }
 0x5c5   : > { %3249 = vmatpush3.bf16.msra.mxu1 %v4223_v8 }
 0x5c6   : > { %3256 = vmatprep.subr.bf16.mxu1 %v3518_v0 }
 0x693   : > { %v2019_v11 = vpop.f32.mrb[0].mxu1 }
 0x694   : > { %v2024_v51 = vrot.slane %v2019_v11, 6  ;;  %v3008_v56 = vpop.f32.mrb[1].mxu1  ;;  %v4289_v11 = vld [vmem:[#allocation3 + $0x8] sm:$0xff] }
 0x696   : > { %v2026_v16 = vadd.f32 %v2024_v51, %v4239_v2 }
 0x698   : > { %3429 = vtanh.f32 %v2026_v16  ;;  %v2027_v17 = vmul.f32 0.5, %v2026_v16 }
 0x69a   : > { %3431 = vtanh.f32 %v2027_v17 }
 0x6a2   : > { %v3430_v26 = vpop.eup %3429 }
 0x6a3   : > { %2037 = vrot.lane.b32.xlu0 %v3430_v26, %s3521_s20 }
 0x6a4   : > { %v3432_v9 = vpop.eup %3431 }
 0x6a5   : > { %v2029_v62 = vadd.f32 1.0, %v3432_v9 }
 0x6a7   : > { %v2030_v48 = vmul.f32 0.5, %v2029_v62 }
 0x6a9   : > { %v2035_v44 = vmul.f32 %v2033_v15, %v2030_v48 }
 0x715   : > { %v2038_v43 = vpop.permute.xlu0 %2037 }
 0x716   : > { %v2040_v63 = vmul.f32 %v2038_v43, %v2030_v48 }
 0x718   : > { %2042 = vrot.lane.b32.xlu1 %v2040_v63, %s3522_s21 }
 0x78a   : > { %v2043_v1 = vpop.permute.xlu1 %2042 }
 0x78b   : > { %v2045_v57 = vadd.f32 %v2043_v1, %v2035_v44 }
 0x78d   : > { %3433 = vtanh.f32 %v2045_v57  ;;  %v2138_v32 = vrot.slane %v2045_v57, 6 }
 0x797   : > { %v3434_v22 = vpop.eup %3433 }
 0x798   : > { %2048 = vrot.lane.b32.xlu0 %v3434_v22, %s3521_s20 }
 0x80a   : > { %v2049_v19 = vpop.permute.xlu0 %2048 }
 0x80b   : > { %v2051_v18 = vmul.f32 %v2049_v19, %v2030_v48 }
 0x80d   : > { %v2053_v23 = vrot.slane %v2051_v18, 2 }
 0x80f   : > { %2054 = vrot.lane.b32.xlu1 %v2053_v23, %s3522_s21 }
 0x881   : > { %v2055_v28 = vpop.permute.xlu1 %2054 }
 0x882   : > { %3018 = vmatmul.mubr.msk.f32.vlgmr.msra.gmra.mrb[2].mxu0 %vm588_vm1, %v2055_v28 }
 0x883   : > { %3252 = vmatpush3.bf16.msra.mxu0 %v4212_v39  ;;  %3039 = vmatprep.mubr.msk.f32.mxu0 %vm3519_vm10, %v3520_v24 }
 0x884   : > { %3253 = vmatprep.subr.bf16.mxu0 %v3518_v0 }
 0x887   : > { %3255 = vmatpush3.bf16.msra.mxu0 %v4223_v8 }
 0x888   : > { %3262 = vmatprep.subr.bf16.mxu0 %v3518_v0 }
 0x955   : > { %v2124_v50 = vpop.f32.mrb[2].mxu0 }
 0x956   : > { %v2129_v38 = vrot.slane %v2124_v50, 4  ;;  %v3019_v41 = vpop.f32.mrb[3].mxu0 }
 0x958   : > { %v2131_v47 = vadd.f32 %v2129_v38, %v4239_v2 }
 0x95a   : > { %3435 = vtanh.f32 %v2131_v47  ;;  %v2132_v58 = vmul.f32 0.5, %v2131_v47 }
 0x95c   : > { %3437 = vtanh.f32 %v2132_v58 }
 0x964   : > { %v3436_v54 = vpop.eup %3435 }
 0x965   : > { %2142 = vrot.lane.b32.xlu0 %v3436_v54, %s3521_s20 }
 0x966   : > { %v3438_v21 = vpop.eup %3437 }
 0x967   : > { %v2134_v42 = vadd.f32 1.0, %v3438_v21 }
 0x969   : > { %v2135_v12 = vmul.f32 0.5, %v2134_v42 }
 0x96b   : > { %v2140_v49 = vmul.f32 %v2138_v32, %v2135_v12 }
 0x9d7   : > { %v2143_v59 = vpop.permute.xlu0 %2142 }
 0x9d8   : > { %v2145_v35 = vmul.f32 %v2143_v59, %v2135_v12 }
 0x9da   : > { %2147 = vrot.lane.b32.xlu1 %v2145_v35, %s3522_s21 }
 0xa4c   : > { %v2148_v20 = vpop.permute.xlu1 %2147 }
 0xa4d   : > { %v2150_v53 = vadd.f32 %v2148_v20, %v2140_v49 }
 0xa4f   : > { %3439 = vtanh.f32 %v2150_v53  ;;  %v2243_v6 = vrot.slane %v2150_v53, 6 }
 0xa59   : > { %v3440_v34 = vpop.eup %3439 }
 0xa5a   : > { %2153 = vrot.lane.b32.xlu0 %v3440_v34, %s3521_s20 }
 0xacc   : > { %v2154_v61 = vpop.permute.xlu0 %2153 }
 0xacd   : > { %v2156_v29 = vmul.f32 %v2154_v61, %v2135_v12 }
 0xacf   : > { %v2158_v33 = vrot.slane %v2156_v29, 4 }
 0xad1   : > { %2159 = vrot.lane.b32.xlu1 %v2158_v33, %s3522_s21 }
 0xb43   : > { %v2160_v30 = vpop.permute.xlu1 %2159 }
 0xb44   : > { %3029 = vmatmul.mubr.msk.f32.vlgmr.msra.gmra.mrb[2].mxu1 %vm588_vm1, %v2160_v30 }
 0xb45   : > { %3258 = vmatpush3.bf16.msra.mxu1 %v4212_v39  ;;  %3050 = vmatprep.mubr.msk.f32.mxu1 %vm3519_vm10, %v3520_v24 }
 0xb46   : > { %3259 = vmatprep.subr.bf16.mxu1 %v3518_v0 }
 0xb49   : > { %3261 = vmatpush3.bf16.msra.mxu1 %v4223_v8 }
 0xb4a   : > { %3268 = vmatprep.subr.bf16.mxu1 %v3518_v0 }
 0xc17   : > { %v2229_v31 = vpop.f32.mrb[2].mxu1 }
 0xc18   : > { %v2234_v36 = vrot.slane %v2229_v31, 2  ;;  %v3030_v3 = vpop.f32.mrb[3].mxu1 }
 0xc1a   : > { %v2236_v52 = vadd.f32 %v2234_v36, %v4239_v2 }
 0xc1c   : > { %3441 = vtanh.f32 %v2236_v52  ;;  %v2237_v40 = vmul.f32 0.5, %v2236_v52 }
 0xc1e   : > { %3443 = vtanh.f32 %v2237_v40 }
 0xc26   : > { %v3442_v4 = vpop.eup %3441 }
 0xc27   : > { %2247 = vrot.lane.b32.xlu0 %v3442_v4, %s3521_s20 }
 0xc28   : > { %v3444_v14 = vpop.eup %3443 }
 0xc29   : > { %v2239_v37 = vadd.f32 1.0, %v3444_v14 }
 0xc2b   : > { %v2240_v5 = vmul.f32 0.5, %v2239_v37 }
 0xc2d   : > { %v2245_v13 = vmul.f32 %v2243_v6, %v2240_v5 }
 0xc99   : > { %v2248_v46 = vpop.permute.xlu0 %2247 }
 0xc9a   : > { %v2250_v45 = vmul.f32 %v2248_v46, %v2240_v5 }
 0xc9c   : > { %2252 = vrot.lane.b32.xlu1 %v2250_v45, %s3522_s21 }
 0xd0e   : > { %v2253_v7 = vpop.permute.xlu1 %2252 }
 0xd0f   : > { %v2255_v60 = vadd.f32 %v2253_v7, %v2245_v13 }
 0xd11   : > { %3445 = vtanh.f32 %v2255_v60  ;;  %v2345_v15 = vrot.slane %v2255_v60, 6 }
 0xd1b   : > { %v3446_v55 = vpop.eup %3445 }
 0xd1c   : > { %2258 = vrot.lane.b32.xlu0 %v3446_v55, %s3521_s20 }
 0xd8e   : > { %v2259_v2 = vpop.permute.xlu0 %2258 }
 0xd8f   : > { %v2261_v25 = vmul.f32 %v2259_v2, %v2240_v5 }
 0xd91   : > { %v2263_v27 = vrot.slane %v2261_v25, 6 }
 0xd93   : > { %2264 = vrot.lane.b32.xlu1 %v2263_v27, %s3522_s21 }
 0xe05   : > { %v2265_v10 = vpop.permute.xlu1 %2264 }
 0xe06   : > { %3040 = vmatmul.mubr.msk.f32.vlgmr.msra.gmra.mrb[4].mxu0 %vm588_vm1, %v2265_v10 }
 0xe07   : > { %3264 = vmatpush3.bf16.msra.mxu0 %v4212_v39  ;;  %3061 = vmatprep.mubr.msk.f32.mxu0 %vm3519_vm10, %v3520_v24 }
 0xe08   : > { %3265 = vmatprep.subr.bf16.mxu0 %v3518_v0 }
 0xe0b   : > { %3267 = vmatpush3.bf16.msra.mxu0 %v4223_v8 }
 0xe0c   : > { %3274 = vmatprep.subr.bf16.mxu0 %v3518_v0 }
 0xed9   : > { %v2334_v51 = vpop.f32.mrb[4].mxu0 }
 0xeda   : > { %v2338_v56 = vadd.f32 %v2334_v51, %v4289_v11  ;;  %v3041_v16 = vpop.f32.mrb[5].mxu0 }
 0xedc   : > { %3447 = vtanh.f32 %v2338_v56  ;;  %v2339_v17 = vmul.f32 0.5, %v2338_v56 }
 0xede   : > { %3449 = vtanh.f32 %v2339_v17 }
 0xee6   : > { %v3448_v26 = vpop.eup %3447 }
 0xee7   : > { %2349 = vrot.lane.b32.xlu0 %v3448_v26, %s3521_s20 }
 0xee8   : > { %v3450_v9 = vpop.eup %3449 }
 0xee9   : > { %v2341_v62 = vadd.f32 1.0, %v3450_v9 }
 0xeeb   : > { %v2342_v48 = vmul.f32 0.5, %v2341_v62 }
 0xeed   : > { %v2347_v44 = vmul.f32 %v2345_v15, %v2342_v48 }
 0xf59   : > { %v2350_v43 = vpop.permute.xlu0 %2349 }
 0xf5a   : > { %v2352_v63 = vmul.f32 %v2350_v43, %v2342_v48 }
 0xf5c   : > { %2354 = vrot.lane.b32.xlu1 %v2352_v63, %s3522_s21 }
 0xfce   : > { %v2355_v1 = vpop.permute.xlu1 %2354 }
 0xfcf   : > { %v2357_v57 = vadd.f32 %v2355_v1, %v2347_v44  ;;  %v2679_v44 = vld [vmem:[%s4349_s8 + $0x8] sm:$0xff]  ;;  %v2680_v1 = vld [vmem:[%s4349_s8 + $0x10] sm:$0xff] }
 0xfd1   : > { %3451 = vtanh.f32 %v2357_v57  ;;  %v2449_v59 = vrot.slane %v2357_v57, 6 }
 0xfdb   : > { %v3452_v22 = vpop.eup %3451 }
 0xfdc   : > { %2360 = vrot.lane.b32.xlu0 %v3452_v22, %s3521_s20  ;;  %v2681_v22 = vld [vmem:[%s4349_s8 + $0x18] sm:$0xff] }
0x104e   : > { %v2361_v19 = vpop.permute.xlu0 %2360 }
0x104f   : > { %v2363_v18 = vmul.f32 %v2361_v19, %v2342_v48  ;;  %v3278_v19 = vpack.c.bf16 %v2681_v22, %v2680_v1 }
0x1051   : > { %2365 = vrot.lane.b32.xlu1 %v2363_v18, %s3522_s21 }
0x10c3   : > { %v2366_v23 = vpop.permute.xlu1 %2365 }
0x10c4   : > { %3051 = vmatmul.mubr.msk.f32.vlgmr.msra.gmra.mrb[4].mxu1 %vm588_vm1, %v2366_v23 }
0x10c5   : > { %3270 = vmatpush3.bf16.msra.mxu1 %v4212_v39  ;;  %3072 = vmatprep.mubr.msk.f32.mxu1 %vm3519_vm10, %v3520_v24 }
0x10c6   : > { %3271 = vmatprep.subr.bf16.mxu1 %v3518_v0 }
0x10c9   : > { %3273 = vmatpush3.bf16.msra.mxu1 %v4223_v8 }
0x1197   : > { %v2435_v28 = vpop.f32.mrb[4].mxu1 }
0x1198   : > { %v2440_v50 = vrot.slane %v2435_v28, 6  ;;  %v3052_v38 = vpop.f32.mrb[5].mxu1 }
0x119a   : > { %v2442_v41 = vadd.f32 %v2440_v50, %v4289_v11 }
0x119c   : > { %3453 = vtanh.f32 %v2442_v41  ;;  %v2443_v54 = vmul.f32 0.5, %v2442_v41  ;;  %v2845_v41 = vld [vmem:[#allocation4] ss:$0 sm:$0xff] }
0x119e   : > { %3455 = vtanh.f32 %v2443_v54 }
0x11a6   : > { %v3454_v47 = vpop.eup %3453 }
0x11a7   : > { %2453 = vrot.lane.b32.xlu0 %v3454_v47, %s3521_s20 }
0x11a8   : > { %v3456_v58 = vpop.eup %3455 }
0x11a9   : > { %v2445_v39 = vadd.f32 1.0, %v3456_v58 }
0x11ab   : > { %v2446_v21 = vmul.f32 0.5, %v2445_v39 }
0x11ad   : > { %v2451_v8 = vmul.f32 %v2449_v59, %v2446_v21 }
0x1219   : > { %v2454_v42 = vpop.permute.xlu0 %2453 }
0x121a   : > { %v2456_v12 = vmul.f32 %v2454_v42, %v2446_v21 }
0x121c   : > { %2458 = vrot.lane.b32.xlu1 %v2456_v12, %s3522_s21 }
0x128e   : > { %v2459_v35 = vpop.permute.xlu1 %2458 }
0x128f   : > { %v2461_v32 = vadd.f32 %v2459_v35, %v2451_v8 }
0x1291   : > { %3457 = vtanh.f32 %v2461_v32  ;;  %v2554_v5 = vrot.slane %v2461_v32, 6 }
0x129b   : > { %v3458_v49 = vpop.eup %3457 }
0x129c   : > { %2464 = vrot.lane.b32.xlu0 %v3458_v49, %s3521_s20 }
0x130e   : > { %v2465_v20 = vpop.permute.xlu0 %2464 }
0x130f   : > { %v2467_v53 = vmul.f32 %v2465_v20, %v2446_v21 }
0x1311   : > { %v2469_v34 = vrot.slane %v2467_v53, 2 }
0x1313   : > { %2470 = vrot.lane.b32.xlu1 %v2469_v34, %s3522_s21 }
0x1385   : > { %v2471_v61 = vpop.permute.xlu1 %2470 }
0x1386   : > { %3062 = vmatmul.mubr.msk.f32.vlgmr.msra.gmra.mrb[6].mxu0 %vm588_vm1, %v2471_v61 }
0x1387   : > { %3083 = vmatprep.mubr.msk.f32.mxu0 %vm3519_vm10, %v3520_v24 }
0x1459   : > { %v2540_v29 = vpop.f32.mrb[6].mxu0 }
0x145a   : > { %v2545_v33 = vrot.slane %v2540_v29, 4  ;;  %v3063_v30 = vpop.f32.mrb[7].mxu0 }
0x145c   : > { %v2547_v31 = vadd.f32 %v2545_v33, %v4289_v11 }
0x145e   : > { %3459 = vtanh.f32 %v2547_v31  ;;  %v2548_v3 = vmul.f32 0.5, %v2547_v31 }
0x1460   : > { %3461 = vtanh.f32 %v2548_v3 }
0x1468   : > { %v3460_v36 = vpop.eup %3459 }
0x1469   : > { %2558 = vrot.lane.b32.xlu0 %v3460_v36, %s3521_s20 }
0x146a   : > { %v3462_v52 = vpop.eup %3461 }
0x146b   : > { %v2550_v4 = vadd.f32 1.0, %v3462_v52 }
0x146d   : > { %v2551_v40 = vmul.f32 0.5, %v2550_v4 }
0x146f   : > { %v2556_v24 = vmul.f32 %v2554_v5, %v2551_v40 }
0x14db   : > { %v2559_v14 = vpop.permute.xlu0 %2558 }
0x14dc   : > { %v2561_v37 = vmul.f32 %v2559_v14, %v2551_v40 }
0x14de   : > { %2563 = vrot.lane.b32.xlu1 %v2561_v37, %s3522_s21 }
0x1550   : > { %v2564_v46 = vpop.permute.xlu1 %2563 }
0x1551   : > { %v2566_v45 = vadd.f32 %v2564_v46, %v2556_v24 }
0x1553   : > { %3463 = vtanh.f32 %v2566_v45  ;;  %v2659_v48 = vrot.slane %v2566_v45, 6 }
0x155d   : > { %v3464_v6 = vpop.eup %3463 }
0x155e   : > { %2569 = vrot.lane.b32.xlu0 %v3464_v6, %s3521_s20 }
0x15d0   : > { %v2570_v13 = vpop.permute.xlu0 %2569 }
0x15d1   : > { %v2572_v7 = vmul.f32 %v2570_v13, %v2551_v40 }
0x15d3   : > { %v2574_v60 = vrot.slane %v2572_v7, 4 }
0x15d5   : > { %2575 = vrot.lane.b32.xlu1 %v2574_v60, %s3522_s21 }
0x1647   : > { %v2576_v55 = vpop.permute.xlu1 %2575 }
0x1648   : > { %3073 = vmatmul.mubr.msk.f32.vlgmr.msra.gmra.mrb[6].mxu1 %vm588_vm1, %v2576_v55 }
0x171b   : > { %v2645_v2 = vpop.f32.mrb[6].mxu1 }
0x171c   : > { %v2650_v25 = vrot.slane %v2645_v2, 2  ;;  %v3074_v27 = vpop.f32.mrb[7].mxu1 }
0x171e   : > { %v2652_v10 = vadd.f32 %v2650_v25, %v4289_v11  ;;  %v2678_v11 = vld [vmem:[%s4349_s8] sm:$0xff] }
0x171f   : > { %v3275_v57 = vpack.c.bf16 %v2679_v44, %v2678_v11 }
0x1720   : > { %3465 = vtanh.f32 %v2652_v10  ;;  %v2653_v56 = vmul.f32 0.5, %v2652_v10 }
0x1721   : > { %3276 = vmatpush3.bf16.msra.mxu0 %v3275_v57 }
0x1722   : > { %3467 = vtanh.f32 %v2653_v56  ;;  %3277 = vmatprep.subr.bf16.mxu0 %v3518_v0 }
0x1725   : > { %3279 = vmatpush3.bf16.msra.mxu0 %v3278_v19 }
0x172a   : > { %v3466_v51 = vpop.eup %3465 }
0x172b   : > { %2663 = vrot.lane.b32.xlu0 %v3466_v51, %s3521_s20 }
0x172c   : > { %v3468_v16 = vpop.eup %3467 }
0x172d   : > { %v2655_v26 = vadd.f32 1.0, %v3468_v16 }
0x172f   : > { %v2656_v17 = vmul.f32 0.5, %v2655_v26 }
0x1731   : > { %v2661_v43 = vmul.f32 %v2659_v48, %v2656_v17 }
0x179d   : > { %v2664_v9 = vpop.permute.xlu0 %2663 }
0x179e   : > { %v2666_v62 = vmul.f32 %v2664_v9, %v2656_v17 }
0x17a0   : > { %2668 = vrot.lane.b32.xlu1 %v2666_v62, %s3522_s21 }
0x1812   : > { %v2669_v63 = vpop.permute.xlu1 %2668 }
0x1813   : > { %v2671_v15 = vadd.f32 %v2669_v63, %v2661_v43 }
0x1815   : > { %3469 = vtanh.f32 %v2671_v15 }
0x181f   : > { %v3470_v18 = vpop.eup %3469 }
0x1820   : > { %2674 = vrot.lane.b32.xlu0 %v3470_v18, %s3521_s20 }
0x1892   : > { %v2675_v23 = vpop.permute.xlu0 %2674 }
0x1893   : > { %v2677_v28 = vmul.f32 %v2675_v23, %v2656_v17 }
0x1895   : > { %v2690_v50 = vrot.slane %v2677_v28, 6 }
0x1897   : > { %2691 = vrot.lane.b32.xlu1 %v2690_v50, %s3522_s21 }
0x1909   : > { %v2692_v38 = vpop.permute.xlu1 %2691 }
0x190a   : > { %3084 = vmatmul.mubr.msk.f32.vlgmr.msra.gmra.mrb[8].mxu0 %vm588_vm1, %v2692_v38 }
0x19dd   : > { %v2761_v47 = vpop.f32.mrb[8].mxu0 }
0x19de   : > { %v2762_v54 = vadd.f32 %v2845_v41, %v2761_v47  ;;  %v3085_v58 = vpop.f32.mrb[9].mxu0 }
0x19e0   : > { %2766 = vst.msk [vmem:[%s4351_s10] sm:$0x3] %vm2765_vm11, %v2762_v54 }
0x19e1 PF: > { %s23_s15 = sadd.s32 1, %s3509_s15  }
0x19e2   : > { %p20_p6 = scmp.ge.s32.totalorder %s23_s15, 4  }
0x19e4   :  { %22 = sbr.rel (!%p20_p6) target bundleno = 4 (0x4), region = 100 }
0x19eb   :  { %2778 = vsyncpa [#allocation6], 1 }
0x19ec   :  { %2780 = vsyncpa [#allocation6 + $0x1], 1 }

</bundles_post_ra>
